<compile_context>
chip_gen: v6e
topology: v6e:2x2x1
jax: 0.10.0
libtpu: 0.0.40
codegen_flags: <defaults>
</compile_context>

<pallas_src>
import functools
import jax
import jax.numpy as jnp
from jax import lax
from jax.experimental import pallas as pl
from jax.experimental.pallas import tpu as pltpu


# ----------------------------------------------------------------------------
# Fused kernel: pad(1) -> conv3x3 (im2col, single matmul) -> global avg/max pool
#               -> Linear -> ReLU -> Linear, one batch element per grid step.
# ----------------------------------------------------------------------------
def spectral_attention_kernel(x_ref, w_ref, b_ref, w1_ref, b1_ref, w2_ref, b2_ref,
                              out_ref, xpad_ref, *, H, W, Cin, Cout):
    # x_ref   : (1, H, W, Cin)    one batch element, NHWC
    # w_ref   : (9*Cin, Cout)     conv3x3 weight, im2col layout (ky, kx, cin) x cout
    # b_ref   : (1, Cout)
    # w1_ref  : (2*Cout, hidden), b1_ref: (1, hidden)
    # w2_ref  : (hidden, Cout),   b2_ref: (1, Cout)
    # out_ref : (1, 1, Cout)
    # xpad_ref: VMEM scratch (H+2, W+2, Cin) holding the zero-padded halo image
    f32 = jnp.float32
    x = x_ref[0].astype(f32)                                    # (H, W, Cin)

    # --- in-kernel zero padding (replaces the wrapper-side jnp.pad HBM pass) ---
    zrow = jnp.zeros((1, W, Cin), f32)
    zcol = jnp.zeros((H + 2, 1, Cin), f32)
    xpad = jnp.concatenate([zrow, x, zrow], axis=0)             # (H+2, W, Cin)
    xpad = jnp.concatenate([zcol, xpad, zcol], axis=1)          # (H+2, W+2, Cin)
    xpad_ref[...] = xpad                                        # aligned full-block store

    # --- im2col: build the (H*W, 9*Cin) patch matrix ONCE, one MXU matmul ---
    taps = []
    for ky in range(3):
        for kx in range(3):
            taps.append(xpad_ref[ky:ky + H, kx:kx + W, :])      # (H, W, Cin) each
    patches = jnp.concatenate(taps, axis=2)                     # (H, W, 9*Cin)
    patches = patches.reshape(H * W, 9 * Cin)
    conv = jnp.dot(patches, w_ref[...].astype(f32),
                   preferred_element_type=f32) + b_ref[...]     # (H*W, Cout)

    # --- global average / max pool (AdaptiveAvg/MaxPool2d(1)) ---
    avg = jnp.mean(conv, axis=0, keepdims=True)                 # (1, Cout)
    mx = jnp.max(conv, axis=0, keepdims=True)                   # (1, Cout)
    feat = jnp.concatenate([avg, mx], axis=1)                   # (1, 2*Cout)

    # --- fused MLP epilogue: Linear -> ReLU -> Linear ---
    h = jnp.dot(feat, w1_ref[...].astype(f32), preferred_element_type=f32) + b1_ref[...]
    h = jnp.maximum(h, 0.0)
    o = jnp.dot(h, w2_ref[...].astype(f32), preferred_element_type=f32) + b2_ref[...]
    out_ref[...] = o.reshape(1, 1, Cout).astype(out_ref.dtype)


# ----------------------------------------------------------------------------
# Wrapper
# ----------------------------------------------------------------------------
def spectral_attention_forward(x_nchw, params):
    """x_nchw: (B, Cin, H, W) float32 -> (B, Cout, 1, 1), matching the PyTorch module."""
    B, Cin, H, W = x_nchw.shape
    w_col = params["conv_w"].reshape(9 * Cin, -1)               # (9*Cin, Cout), (ky,kx,cin) rows
    Cout = w_col.shape[-1]
    hidden = params["w1"].shape[-1]

    x_nhwc = jnp.transpose(x_nchw, (0, 2, 3, 1))                # layout plumbing only

    kernel = functools.partial(spectral_attention_kernel, H=H, W=W, Cin=Cin, Cout=Cout)

    # Generation-safe scoped-VMEM request (tiny here; clamp keeps it valid on v5e..v7x).
    est = 4 * 4 * (H * W * max(Cin, 8)
                   + (H + 2) * (W + 2) * max(Cin, 8)
                   + H * W * (9 * Cin + Cout)
                   + 9 * Cin * Cout)
    vmem_bytes = int(min(max(est, 16 * 1024 * 1024), 48 * 1024 * 1024))

    out = pl.pallas_call(
        kernel,
        out_shape=jax.ShapeDtypeStruct((B, 1, Cout), jnp.float32),
        grid=(B,),
        in_specs=[
            pl.BlockSpec((1, H, W, Cin), lambda b: (b, 0, 0, 0)),
            pl.BlockSpec((9 * Cin, Cout), lambda b: (0, 0)),
            pl.BlockSpec((1, Cout), lambda b: (0, 0)),
            pl.BlockSpec((2 * Cout, hidden), lambda b: (0, 0)),
            pl.BlockSpec((1, hidden), lambda b: (0, 0)),
            pl.BlockSpec((hidden, Cout), lambda b: (0, 0)),
            pl.BlockSpec((1, Cout), lambda b: (0, 0)),
        ],
        out_specs=pl.BlockSpec((1, 1, Cout), lambda b: (b, 0, 0)),
        scratch_shapes=[pltpu.VMEM((H + 2, W + 2, Cin), jnp.float32)],
        compiler_params=pltpu.CompilerParams(
            dimension_semantics=("parallel",),
            vmem_limit_bytes=vmem_bytes),
    )(x_nhwc, w_col, params["conv_b"].reshape(1, Cout),
      params["w1"], params["b1"].reshape(1, hidden),
      params["w2"], params["b2"].reshape(1, Cout))

    return out[:, 0][:, :, None, None]                          # (B, Cout, 1, 1)


# ----------------------------------------------------------------------------
# Pure-JAX reference (same math as the PyTorch SpectralAttention.forward)
# ----------------------------------------------------------------------------
def spectral_attention_reference(x_nchw, params):
    conv = lax.conv_general_dilated(
        x_nchw, params["conv_w"], window_strides=(1, 1), padding=((1, 1), (1, 1)),
        dimension_numbers=("NCHW", "HWIO", "NCHW"),
        precision=lax.Precision.HIGHEST)
    conv = conv + params["conv_b"][None, :, None, None]
    avg = conv.mean(axis=(2, 3))
    mx = conv.max(axis=(2, 3))
    feat = jnp.concatenate([avg, mx], axis=1)
    h = jnp.maximum(
        jnp.dot(feat, params["w1"], precision=lax.Precision.HIGHEST) + params["b1"], 0.0)
    o = jnp.dot(h, params["w2"], precision=lax.Precision.HIGHEST) + params["b2"]
    return o[:, :, None, None]


def init_params(key, in_channels, out_channels, ratio=2):
    hidden = out_channels // ratio
    k = jax.random.split(key, 6)
    scale = 0.1
    return {
        "conv_w": scale * jax.random.normal(k[0], (3, 3, in_channels, out_channels), jnp.float32),
        "conv_b": scale * jax.random.normal(k[1], (out_channels,), jnp.float32),
        "w1": scale * jax.random.normal(k[2], (2 * out_channels, hidden), jnp.float32),
        "b1": scale * jax.random.normal(k[3], (hidden,), jnp.float32),
        "w2": scale * jax.random.normal(k[4], (hidden, out_channels), jnp.float32),
        "b2": scale * jax.random.normal(k[5], (out_channels,), jnp.float32),
    }


if __name__ == "__main__":
    B, Cin, Cout, H, W = 2, 4, 8, 16, 16
    key = jax.random.PRNGKey(0)
    kx, kp = jax.random.split(key)
    x = jax.random.normal(kx, (B, Cin, H, W), jnp.float32)      # NCHW, as in PyTorch
    params = init_params(kp, Cin, Cout, ratio=2)

    out = spectral_attention_forward(x, params)
    jax.block_until_ready(out)
    assert out.shape == (B, Cout, 1, 1)

    ref = spectral_attention_reference(x, params)
    err = float(jnp.max(jnp.abs(out - ref)))
    assert jnp.allclose(out, ref, rtol=5e-3, atol=5e-3), f"max abs err {err}"
    print("KERNEL_OK")
</pallas_src>

<mosaic_0001>
module attributes {stable_mosaic.version = 11 : i64} {
  func.func @spectral_attention_kernel(%arg0: i32, %arg1: memref<1x16x16x4xf32, #tpu.memory_space<vmem>>, %arg2: memref<36x8xf32, #tpu.memory_space<vmem>>, %arg3: memref<1x8xf32, #tpu.memory_space<vmem>>, %arg4: memref<16x4xf32, #tpu.memory_space<vmem>>, %arg5: memref<1x4xf32, #tpu.memory_space<vmem>>, %arg6: memref<4x8xf32, #tpu.memory_space<vmem>>, %arg7: memref<1x8xf32, #tpu.memory_space<vmem>>, %arg8: memref<1x1x8xf32, #tpu.memory_space<vmem>>, %arg9: memref<18x18x4xf32, #tpu.memory_space<vmem>>) attributes {dimension_semantics = [#tpu.dimension_semantics<parallel>], iteration_bounds = array<i64: 2>, scalar_prefetch = 0 : i64, scratch_operands = 1 : i64, tpu.core_type = #tpu.core_type<tc>, window_params = [{transform_indices = @transform_0, window_bounds = array<i64: 1, 16, 16, 4>}, {pipeline_mode = #tpu.pipeline_mode<synchronous>, transform_indices = @transform_1, window_bounds = array<i64: 36, 8>}, {pipeline_mode = #tpu.pipeline_mode<synchronous>, transform_indices = @transform_2, window_bounds = array<i64: 1, 8>}, {pipeline_mode = #tpu.pipeline_mode<synchronous>, transform_indices = @transform_3, window_bounds = array<i64: 16, 4>}, {pipeline_mode = #tpu.pipeline_mode<synchronous>, transform_indices = @transform_4, window_bounds = array<i64: 1, 4>}, {pipeline_mode = #tpu.pipeline_mode<synchronous>, transform_indices = @transform_5, window_bounds = array<i64: 4, 8>}, {pipeline_mode = #tpu.pipeline_mode<synchronous>, transform_indices = @transform_6, window_bounds = array<i64: 1, 8>}, {transform_indices = @transform_7, window_bounds = array<i64: 1, 1, 8>}]} {
    %c0 = arith.constant 0 : index
    %c0_0 = arith.constant 0 : index
    %c0_1 = arith.constant 0 : index
    %c0_2 = arith.constant 0 : index
    %0 = vector.load %arg1[%c0, %c0_0, %c0_1, %c0_2] : memref<1x16x16x4xf32, #tpu.memory_space<vmem>>, vector<1x16x16x4xf32>
    %1 = vector.shape_cast %0 : vector<1x16x16x4xf32> to vector<16x16x4xf32>
    %cst = arith.constant 0.000000e+00 : f32
    %2 = vector.broadcast %cst : f32 to vector<1x16x4xf32>
    %cst_3 = arith.constant 0.000000e+00 : f32
    %3 = vector.broadcast %cst_3 : f32 to vector<18x1x4xf32>
    %4 = tpu.concatenate %2, %1, %2 in 0 : vector<1x16x4xf32>, vector<16x16x4xf32>, vector<1x16x4xf32> -> vector<18x16x4xf32>
    %5 = tpu.concatenate %3, %4, %3 in 1 : vector<18x1x4xf32>, vector<18x16x4xf32>, vector<18x1x4xf32> -> vector<18x18x4xf32>
    %c0_4 = arith.constant 0 : index
    %c0_5 = arith.constant 0 : index
    %c0_6 = arith.constant 0 : index
    %6 = vector.load %arg9[%c0_4, %c0_5, %c0_6] : memref<18x18x4xf32, #tpu.memory_space<vmem>>, vector<18x18x4xf32>
    tpu.vector_store %arg9[%c0_4, %c0_5, %c0_6], %5 {strides = array<i32>} : memref<18x18x4xf32, #tpu.memory_space<vmem>>, vector<18x18x4xf32>,
    %c0_7 = arith.constant 0 : index
    %c0_8 = arith.constant 0 : index
    %c0_9 = arith.constant 0 : index
    %7 = vector.load %arg9[%c0_7, %c0_8, %c0_9] : memref<18x18x4xf32, #tpu.memory_space<vmem>>, vector<16x16x4xf32>
    %c0_10 = arith.constant 0 : index
    %c1 = arith.constant 1 : index
    %c0_11 = arith.constant 0 : index
    %8 = vector.load %arg9[%c0_10, %c1, %c0_11] : memref<18x18x4xf32, #tpu.memory_space<vmem>>, vector<16x16x4xf32>
    %c0_12 = arith.constant 0 : index
    %c2 = arith.constant 2 : index
    %c0_13 = arith.constant 0 : index
    %9 = vector.load %arg9[%c0_12, %c2, %c0_13] : memref<18x18x4xf32, #tpu.memory_space<vmem>>, vector<16x16x4xf32>
    %c1_14 = arith.constant 1 : index
    %c0_15 = arith.constant 0 : index
    %c0_16 = arith.constant 0 : index
    %10 = vector.load %arg9[%c1_14, %c0_15, %c0_16] : memref<18x18x4xf32, #tpu.memory_space<vmem>>, vector<16x16x4xf32>
    %c1_17 = arith.constant 1 : index
    %c1_18 = arith.constant 1 : index
    %c0_19 = arith.constant 0 : index
    %11 = vector.load %arg9[%c1_17, %c1_18, %c0_19] : memref<18x18x4xf32, #tpu.memory_space<vmem>>, vector<16x16x4xf32>
    %c1_20 = arith.constant 1 : index
    %c2_21 = arith.constant 2 : index
    %c0_22 = arith.constant 0 : index
    %12 = vector.load %arg9[%c1_20, %c2_21, %c0_22] : memref<18x18x4xf32, #tpu.memory_space<vmem>>, vector<16x16x4xf32>
    %c2_23 = arith.constant 2 : index
    %c0_24 = arith.constant 0 : index
    %c0_25 = arith.constant 0 : index
    %13 = vector.load %arg9[%c2_23, %c0_24, %c0_25] : memref<18x18x4xf32, #tpu.memory_space<vmem>>, vector<16x16x4xf32>
    %c2_26 = arith.constant 2 : index
    %c1_27 = arith.constant 1 : index
    %c0_28 = arith.constant 0 : index
    %14 = vector.load %arg9[%c2_26, %c1_27, %c0_28] : memref<18x18x4xf32, #tpu.memory_space<vmem>>, vector<16x16x4xf32>
    %c2_29 = arith.constant 2 : index
    %c2_30 = arith.constant 2 : index
    %c0_31 = arith.constant 0 : index
    %15 = vector.load %arg9[%c2_29, %c2_30, %c0_31] : memref<18x18x4xf32, #tpu.memory_space<vmem>>, vector<16x16x4xf32>
    %16 = tpu.concatenate %7, %8, %9, %10, %11, %12, %13, %14, %15 in 2 : vector<16x16x4xf32>, vector<16x16x4xf32>, vector<16x16x4xf32>, vector<16x16x4xf32>, vector<16x16x4xf32>, vector<16x16x4xf32>, vector<16x16x4xf32>, vector<16x16x4xf32>, vector<16x16x4xf32> -> vector<16x16x36xf32>
    %17 = vector.shape_cast %16 : vector<16x16x36xf32> to vector<256x36xf32>
    %c0_32 = arith.constant 0 : index
    %c0_33 = arith.constant 0 : index
    %18 = vector.load %arg2[%c0_32, %c0_33] : memref<36x8xf32, #tpu.memory_space<vmem>>, vector<36x8xf32>
    %cst_34 = arith.constant dense<0.000000e+00> : vector<256x8xf32>
    %19 = tpu.matmul %17, %18, %cst_34 {dimension_numbers = #tpu.dot_dimension_numbers<[1], [0], [0], [1], [0, 0, 1, 1], [], []>} : vector<256x36xf32>, vector<36x8xf32>, vector<256x8xf32> -> vector<256x8xf32>
    %c0_35 = arith.constant 0 : index
    %c0_36 = arith.constant 0 : index
    %20 = vector.load %arg3[%c0_35, %c0_36] : memref<1x8xf32, #tpu.memory_space<vmem>>, vector<1x8xf32>
    %21 = vector.broadcast %20 : vector<1x8xf32> to vector<256x8xf32>
    %22 = arith.addf %19, %21 : vector<256x8xf32>
    %cst_37 = arith.constant dense<0.000000e+00> : vector<8xf32>
    %23 = vector.multi_reduction <add>, %22, %cst_37 [0] : vector<256x8xf32> to vector<8xf32>
    %24 = vector.shape_cast %23 : vector<8xf32> to vector<1x8xf32>
    %cst_38 = arith.constant 2.560000e+02 : f32
    %25 = vector.broadcast %cst_38 : f32 to vector<1x8xf32>
    %26 = arith.divf %24, %25 : vector<1x8xf32>
    %cst_39 = arith.constant dense<0xFF800000> : vector<8xf32>
    %27 = vector.multi_reduction <maximumf>, %22, %cst_39 [0] : vector<256x8xf32> to vector<8xf32>
    %28 = vector.shape_cast %27 : vector<8xf32> to vector<1x8xf32>
    %29 = tpu.concatenate %26, %28 in 1 : vector<1x8xf32>, vector<1x8xf32> -> vector<1x16xf32>
    %c0_40 = arith.constant 0 : index
    %c0_41 = arith.constant 0 : index
    %30 = vector.load %arg4[%c0_40, %c0_41] : memref<16x4xf32, #tpu.memory_space<vmem>>, vector<16x4xf32>
    %cst_42 = arith.constant dense<0.000000e+00> : vector<1x4xf32>
    %31 = tpu.matmul %29, %30, %cst_42 {dimension_numbers = #tpu.dot_dimension_numbers<[1], [0], [0], [1], [0, 0, 1, 1], [], []>} : vector<1x16xf32>, vector<16x4xf32>, vector<1x4xf32> -> vector<1x4xf32>
    %c0_43 = arith.constant 0 : index
    %c0_44 = arith.constant 0 : index
    %32 = vector.load %arg5[%c0_43, %c0_44] : memref<1x4xf32, #tpu.memory_space<vmem>>, vector<1x4xf32>
    %33 = arith.addf %31, %32 : vector<1x4xf32>
    %cst_45 = arith.constant 0.000000e+00 : f32
    %34 = vector.broadcast %cst_45 : f32 to vector<1x4xf32>
    %35 = arith.maximumf %33, %34 : vector<1x4xf32>
    %c0_46 = arith.constant 0 : index
    %c0_47 = arith.constant 0 : index
    %36 = vector.load %arg6[%c0_46, %c0_47] : memref<4x8xf32, #tpu.memory_space<vmem>>, vector<4x8xf32>
    %cst_48 = arith.constant dense<0.000000e+00> : vector<1x8xf32>
    %37 = tpu.matmul %35, %36, %cst_48 {dimension_numbers = #tpu.dot_dimension_numbers<[1], [0], [0], [1], [0, 0, 1, 1], [], []>} : vector<1x4xf32>, vector<4x8xf32>, vector<1x8xf32> -> vector<1x8xf32>
    %c0_49 = arith.constant 0 : index
    %c0_50 = arith.constant 0 : index
    %38 = vector.load %arg7[%c0_49, %c0_50] : memref<1x8xf32, #tpu.memory_space<vmem>>, vector<1x8xf32>
    %39 = arith.addf %37, %38 : vector<1x8xf32>
    %40 = vector.shape_cast %39 : vector<1x8xf32> to vector<1x1x8xf32>
    %c0_51 = arith.constant 0 : index
    %c0_52 = arith.constant 0 : index
    %c0_53 = arith.constant 0 : index
    %41 = vector.load %arg8[%c0_51, %c0_52, %c0_53] : memref<1x1x8xf32, #tpu.memory_space<vmem>>, vector<1x1x8xf32>
    tpu.vector_store %arg8[%c0_51, %c0_52, %c0_53], %40 {strides = array<i32>} : memref<1x1x8xf32, #tpu.memory_space<vmem>>, vector<1x1x8xf32>,
    return
  }
  func.func @transform_0(%arg0: i32) -> (i32, i32, i32, i32) {
    %c0_i32 = arith.constant 0 : i32
    %c0_i32_0 = arith.constant 0 : i32
    %c0_i32_1 = arith.constant 0 : i32
    %c0_i32_2 = arith.constant 0 : i32
    return %arg0, %c0_i32, %c0_i32_0, %c0_i32_1 : i32, i32, i32, i32
  }
  func.func @transform_1(%arg0: i32) -> (i32, i32) {
    %c0_i32 = arith.constant 0 : i32
    %c0_i32_0 = arith.constant 0 : i32
    %c0_i32_1 = arith.constant 0 : i32
    return %c0_i32, %c0_i32_0 : i32, i32
  }
  func.func @transform_2(%arg0: i32) -> (i32, i32) {
    %c0_i32 = arith.constant 0 : i32
    %c0_i32_0 = arith.constant 0 : i32
    %c0_i32_1 = arith.constant 0 : i32
    return %c0_i32, %c0_i32_0 : i32, i32
  }
  func.func @transform_3(%arg0: i32) -> (i32, i32) {
    %c0_i32 = arith.constant 0 : i32
    %c0_i32_0 = arith.constant 0 : i32
    %c0_i32_1 = arith.constant 0 : i32
    return %c0_i32, %c0_i32_0 : i32, i32
  }
  func.func @transform_4(%arg0: i32) -> (i32, i32) {
    %c0_i32 = arith.constant 0 : i32
    %c0_i32_0 = arith.constant 0 : i32
    %c0_i32_1 = arith.constant 0 : i32
    return %c0_i32, %c0_i32_0 : i32, i32
  }
  func.func @transform_5(%arg0: i32) -> (i32, i32) {
    %c0_i32 = arith.constant 0 : i32
    %c0_i32_0 = arith.constant 0 : i32
    %c0_i32_1 = arith.constant 0 : i32
    return %c0_i32, %c0_i32_0 : i32, i32
  }
  func.func @transform_6(%arg0: i32) -> (i32, i32) {
    %c0_i32 = arith.constant 0 : i32
    %c0_i32_0 = arith.constant 0 : i32
    %c0_i32_1 = arith.constant 0 : i32
    return %c0_i32, %c0_i32_0 : i32, i32
  }
  func.func @transform_7(%arg0: i32) -> (i32, i32, i32) {
    %c0_i32 = arith.constant 0 : i32
    %c0_i32_0 = arith.constant 0 : i32
    %c0_i32_1 = arith.constant 0 : i32
    return %arg0, %c0_i32, %c0_i32_0 : i32, i32, i32
  }
}

</mosaic_0001>

<bundles_post_ra>
// kernel: tpu_custom_call.1
= control target key start
LH: loop header
LB: loop body
LE: loop exit
PB: predicated region body
PF: predicated region fallthrough
CT: control target
= control target key end

     0   :  { %12 = vsyncpa [#allocation4], 0  ;;  %s4666_s0 = inlined_call_operand.vmem [shape: f32[2,16,16,4], index: 0, kind: input, shape index: {}]   ;;  %s4667_s1 = inlined_call_operand.vmem [shape: f32[36,8], index: 1, kind: input, shape index: {}]   ;;  %s4668_s2 = inlined_call_operand.vmem [shape: f32[1,8], index: 2, kind: input, shape index: {}]   ;;  %s4669_s3 = inlined_call_operand.vmem [shape: f32[16,4], index: 3, kind: input, shape index: {}]   ;;  %s4670_s4 = inlined_call_operand.vmem [shape: f32[1,4], index: 4, kind: input, shape index: {}]   ;;  %s4671_s5 = inlined_call_operand.vmem [shape: f32[4,8], index: 5, kind: input, shape index: {}]   ;;  %s4672_s6 = inlined_call_operand.vmem [shape: f32[1,8], index: 6, kind: input, shape index: {}]   ;;  %s4673_s7 = inlined_call_operand.hbm [shape: f32[2,1,8], index: 7, kind: output, shape index: {}]  }
   0x1   :  { %14 = vsyncpa [#allocation4 + $0x1], 0  ;;  %s3157_s24 = smov 0   ;;  %s3159_s25 = smov 0  }
   0x2   :  { %s3161_s26 = smov 0   ;;  %s3163_s27 = smov 0  }
   0x3 LB: > { %s3178_s28 = sadd.s32 4294967295, %s3104_s27   ;;  %s2817_s29 = sadd.s32 4294967294, %s3104_s27   ;;  %s3104_s27 = sphi %s3163_s27, %s4679_s27   ;;  %s3100_s26 = sphi %s3161_s26, %s4678_s26   ;;  %s3096_s25 = sphi %s3159_s25, %s4677_s25   ;;  %s3092_s24 = sphi %s3157_s24, %s4676_s24  }
   0x4   : > { %s3182_s30 = sadd.s32 1, %s3104_s27   ;;  %s179_s8 = sadd.s32 1, %s3100_s26 }
   0x5   : > { %s176_s9 = ssub.s32 %s3104_s27, %s3182_s30  ;;  %p189_p0 = scmp.ne.s32.totalorder %s3100_s26, %s3096_s25 }
   0x6   : > { %p177_p1 = scmp.eq.s32.totalorder %s176_s9, 0  ;;  %p190_p2 = scmp.eq.s32.totalorder %s3178_s28, 1 }
   0x7   : > { %p195_p3 = scmp.ne.s32.totalorder %s3096_s25, %s3092_s24  ;;  %p196_p4 = scmp.eq.s32.totalorder %s2817_s29, 1 }
   0x8   : > { %s3193_s10 = scalar_select %p177_p1, %s3100_s26, %s179_s8  }
   0x9   : > { %p3195_p5 = por %p190_p2, %p189_p0  ;;  %p3199_p6 = por %p196_p4, %p195_p3 }
   0xa   : > { %p2820_p7 = scmp.ge.s32.totalorder %s3104_s27, 1  ;;  %p240_p8 = scmp.lt.s32.totalorder %s3104_s27, 3 }
   0xc   : > { %p241_p9 = pnand %p2820_p7, %p240_p8 }
   0xd   : > { %p271_p10 = scmp.lt.s32.totalorder (!%p241_p9), %s3178_s28, 1  ;;  %s3107_s18 = smov (!%p241_p9), 8  }
   0xe   : > { %244 = sbr.rel (%p241_p9) target bundleno = 1390 (0x56e), region = 48  ;;  %s3108_s19 = smov (!%p241_p9), 4  }
   0xf   : > { %s3109_s20 = smov (!%p241_p9), 12   ;;  %s3110_s21 = smov (!%p241_p9), 16  }
  0x10   : > { %s3111_s22 = smov (!%p241_p9), 20   ;;  %s3112_s23 = smov (!%p241_p9), 24  }
  0x11   : > { %s3113_s8 = smov (!%p241_p9), 28   ;;  %s2860_s15 = sshll.u32 (!%p241_p9), %s3178_s28, 4 }
  0x13   : > { %vm341_vm0 = vcmask 1040384   ;;  %vm476_vm1 = vcmask 31744   ;;  %v3106_v0 = vmov 0.0   ;;  %vm479_vm2 = vcmask 25600   ;;  %s272_s13 = scalar_select %p271_p10, %s3178_s28, 1 }
  0x14   : > { %v342_v1 = vrot.slane %v3106_v0, 7  ;;  %vm2218_vm3 = vcmask 1043456   ;;  %vm1878_vm4 = vcmask 64512   ;;  %vm1911_vm5 = vcmask 97280   ;;  %s3116_s28 = smov [#allocation3]  }
  0x15   : > { %s2863_s14 = sshll.u32 %s272_s13, 8  ;;  %vm1944_vm6 = vcmask 130048   ;;  %vm1977_vm7 = vcmask 162816   ;;  %vm2010_vm8 = vcmask 195584   ;;  %vm2043_vm9 = vcmask 228352   ;;  %s269_s13 = sand.u32 1, %s3096_s25  }
  0x16   : > { %v442_v2 = vsel %vm341_vm0, 0.0, %v342_v1  ;;  %478 = vst.msk [vmem:[#allocation2 + $0x8] sm:$0xff] %vm476_vm1, %v342_v1  ;;  %530 = vst.msk [vmem:[#allocation2 + $0x1a0] sm:$0xff] %vm476_vm1, %v342_v1  ;;  %v459_v3 = vsel %vm341_vm0, %v342_v1, 0.0  ;;  %s3219_s17 = scalar_lea.vmem %s4666_s0, %s2863_s14  ;;  %s3114_s14 = smov 32   ;;  %vm2076_vm10 = vcmask 261120  }
  0x17   : > { %477 = vst.msk [vmem:[#allocation2] sm:$0xff] %vm476_vm1, %v442_v2  ;;  %529 = vst.msk [vmem:[#allocation2 + $0x198] sm:$0xff] %vm476_vm1, %v442_v2  ;;  %v276_v4 = vld [vmem:[%s3219_s17] sm:$0xff]  ;;  %v277_v5 = vld [vmem:[%s3219_s17 + $0x8] sm:$0xff]  ;;  %vm2121_vm11 = vcmask 293888   ;;  %vm3115_vm12 = vmmov 0  }
  0x18   : > { %480 = vst.msk [vmem:[#allocation2 + $0x10] sm:$0x3] %vm479_vm2, %v459_v3  ;;  %531 = vst.msk [vmem:[#allocation2 + $0x1a8] sm:$0x3] %vm479_vm2, %v459_v3  ;;  %v278_v6 = vld [vmem:[%s3219_s17 + $0x10] sm:$0xff]  ;;  %v344_v7 = vrot.slane %v276_v4, 7 }
  0x19   : > { %v345_v8 = vrot.slane %v277_v5, 7  ;;  %v347_v9 = vrot.slane %v278_v6, 7  ;;  %v279_v10 = vld [vmem:[%s3219_s17 + $0x18] sm:$0xff]  ;;  %v280_v11 = vld [vmem:[%s3219_s17 + $0x20] sm:$0xff]  ;;  %v281_v12 = vld [vmem:[%s3219_s17 + $0x28] sm:$0xff]  ;;  %vm2747_vm13 = vcmask 57344  }
  0x1a   : > { %v348_v13 = vrot.slane %v279_v10, 7  ;;  %v350_v14 = vrot.slane %v280_v11, 7  ;;  %v351_v15 = vrot.slane %v281_v12, 7  ;;  %v282_v16 = vld [vmem:[%s3219_s17 + $0x30] sm:$0xff]  ;;  %v292_v17 = vld [vmem:[%s3219_s17 + $0x80] sm:$0xff]  ;;  %v293_v18 = vld [vmem:[%s3219_s17 + $0x88] sm:$0xff] }
  0x1b   : > { %v443_v19 = vsel %vm341_vm0, 0.0, %v344_v7  ;;  %v346_v20 = vsel %vm341_vm0, %v344_v7, %v345_v8  ;;  %v460_v21 = vsel %vm341_vm0, %v345_v8, 0.0  ;;  %v444_v22 = vsel %vm341_vm0, 0.0, %v347_v9  ;;  %v283_v23 = vld [vmem:[%s3219_s17 + $0x38] sm:$0xff]  ;;  %v294_v24 = vld [vmem:[%s3219_s17 + $0x90] sm:$0xff]  ;;  %v284_v40 = vld [vmem:[%s3219_s17 + $0x40] sm:$0xff] }
  0x1c   : > { %481 = vst.msk [vmem:[#allocation2 + $0x18] sm:$0xff] %vm476_vm1, %v443_v19  ;;  %482 = vst.msk [vmem:[#allocation2 + $0x20] sm:$0xff] %vm476_vm1, %v346_v20  ;;  %v349_v27 = vsel %vm341_vm0, %v347_v9, %v348_v13  ;;  %v461_v28 = vsel %vm341_vm0, %v348_v13, 0.0  ;;  %v445_v29 = vsel %vm341_vm0, 0.0, %v350_v14  ;;  %v352_v30 = vsel %vm341_vm0, %v350_v14, %v351_v15  ;;  %v295_v39 = vld [vmem:[%s3219_s17 + $0x98] sm:$0xff]  ;;  %v285_v58 = vld [vmem:[%s3219_s17 + $0x48] sm:$0xff] }
  0x1d   : > { %483 = vst.msk [vmem:[#allocation2 + $0x28] sm:$0x3] %vm479_vm2, %v460_v21  ;;  %486 = vst.msk [vmem:[#allocation2 + $0x40] sm:$0x3] %vm479_vm2, %v461_v28  ;;  %v462_v32 = vsel %vm341_vm0, %v351_v15, 0.0  ;;  %v353_v33 = vrot.slane %v282_v16, 7 }
  0x1e   : > { %v596_v25 = vld [vmem:[#allocation2 + $0x2] sm:$0xff]  ;;  %484 = vst.msk [vmem:[#allocation2 + $0x30] sm:$0xff] %vm476_vm1, %v444_v22  ;;  %485 = vst.msk [vmem:[#allocation2 + $0x38] sm:$0xff] %vm476_vm1, %v349_v27  ;;  %v368_v34 = vrot.slane %v292_v17, 7  ;;  %v369_v35 = vrot.slane %v293_v18, 7  ;;  %v354_v37 = vrot.slane %v283_v23, 7 }
  0x1f   : > { %v564_v26 = vld [vmem:[#allocation2 + $0x1] sm:$0xff]  ;;  %982 = vrot.lane.b32.xlu1 %v596_v25, %s3107_s18  ;;  %v597_v31 = vld [vmem:[#allocation2 + $0xa] sm:$0xff]  ;;  %487 = vst.msk [vmem:[#allocation2 + $0x48] sm:$0xff] %vm476_vm1, %v445_v29  ;;  %488 = vst.msk [vmem:[#allocation2 + $0x50] sm:$0xff] %vm476_vm1, %v352_v30  ;;  %v371_v38 = vrot.slane %v294_v24, 7  ;;  %v446_v41 = vsel %vm341_vm0, 0.0, %v353_v33 }
  0x20   : > { %854 = vrot.lane.b32.xlu0 %v564_v26, %s3108_s19  ;;  %v565_v36 = vld [vmem:[#allocation2 + $0x9] sm:$0xff]  ;;  %489 = vst.msk [vmem:[#allocation2 + $0x58] sm:$0x3] %vm479_vm2, %v462_v32  ;;  %v370_v42 = vsel %vm341_vm0, %v368_v34, %v369_v35  ;;  %v451_v43 = vsel %vm341_vm0, 0.0, %v368_v34  ;;  %v468_v44 = vsel %vm341_vm0, %v369_v35, 0.0  ;;  %v355_v45 = vsel %vm341_vm0, %v353_v33, %v354_v37  ;;  %v296_v63 = vld [vmem:[%s3219_s17 + $0xa0] sm:$0xff] }
  0x21   : > { %490 = vst.msk [vmem:[#allocation2 + $0x60] sm:$0xff] %vm476_vm1, %v446_v41  ;;  %505 = vst.msk [vmem:[#allocation2 + $0xd8] sm:$0xff] %vm476_vm1, %v451_v43  ;;  %v463_v46 = vsel %vm341_vm0, %v354_v37, 0.0  ;;  %v452_v47 = vsel %vm341_vm0, 0.0, %v371_v38  ;;  %v372_v48 = vrot.slane %v295_v39, 7  ;;  %v356_v49 = vrot.slane %v284_v40, 7 }
  0x22   : > { %506 = vst.msk [vmem:[#allocation2 + $0xe0] sm:$0xff] %vm476_vm1, %v370_v42  ;;  %491 = vst.msk [vmem:[#allocation2 + $0x68] sm:$0xff] %vm476_vm1, %v355_v45  ;;  %v357_v59 = vrot.slane %v285_v58, 7  ;;  %v374_v1 = vrot.slane %v296_v63, 7  ;;  %v2113_v2 = vld [vmem:[%s4667_s1 + $0x20] sm:$0xf] }
  0x23   : > { %507 = vst.msk [vmem:[#allocation2 + $0xe8] sm:$0x3] %vm479_vm2, %v468_v44  ;;  %984 = vrot.lane.b32.xlu1 %v597_v31, %s3107_s18  ;;  %492 = vst.msk [vmem:[#allocation2 + $0x70] sm:$0x3] %vm479_vm2, %v463_v46  ;;  %v373_v50 = vsel %vm341_vm0, %v371_v38, %v372_v48  ;;  %v3271_v51 = vld [vmem:[#allocation2 + $0x18] sm:$0xff]  ;;  %v3273_v52 = vld [vmem:[#allocation2 + $0x20] sm:$0xff]  ;;  %2906 = vmatprep.subr.msk.mxu0 %vm2218_vm3, %v2113_v2 }
  0x24   : > { %856 = vrot.lane.b32.xlu0 %v565_v36, %s3108_s19  ;;  %508 = vst.msk [vmem:[#allocation2 + $0xf0] sm:$0xff] %vm476_vm1, %v452_v47  ;;  %509 = vst.msk [vmem:[#allocation2 + $0xf8] sm:$0xff] %vm476_vm1, %v373_v50  ;;  %v447_v53 = vsel %vm341_vm0, 0.0, %v356_v49  ;;  %v469_v54 = vsel %vm341_vm0, %v372_v48, 0.0  ;;  %v661_v55 = vld [vmem:[#allocation2 + $0x19] sm:$0xff]  ;;  %v662_v56 = vld [vmem:[#allocation2 + $0x21] sm:$0xff]  ;;  %v358_v60 = vsel %vm341_vm0, %v356_v49, %v357_v59  ;;  %2976 = vmatprep.subr.msk.mxu1 %vm2218_vm3, %v2113_v2 }
  0x25   : > { %493 = vst.msk [vmem:[#allocation2 + $0x78] sm:$0xff] %vm476_vm1, %v447_v53  ;;  %v693_v57 = vld [vmem:[#allocation2 + $0x1a] sm:$0xff]  ;;  %v694_v61 = vld [vmem:[#allocation2 + $0x22] sm:$0xff]  ;;  %v3292_v62 = vld [vmem:[#allocation2 + $0x30] sm:$0xff]  ;;  %v453_v3 = vsel %vm341_vm0, 0.0, %v374_v1  ;;  %2907 = vmatpush3.msk.msra.mxu0 %vm2218_vm3, %v2113_v2  ;;  %2981 = vmatpush3.msk.msra.mxu1 %vm2218_vm3, %v2113_v2  ;;  %v464_v5 = vsel %vm341_vm0, %v357_v59, 0.0 }
  0x26   : > { %510 = vst.msk [vmem:[#allocation2 + $0x100] sm:$0x3] %vm479_vm2, %v469_v54  ;;  %v2112_v4 = vld [vmem:[%s4667_s1 + $0x18] sm:$0xff]  ;;  %v2111_v8 = vld [vmem:[%s4667_s1 + $0x10] sm:$0xff]  ;;  %495 = vst.msk [vmem:[#allocation2 + $0x88] sm:$0x3] %vm479_vm2, %v464_v5 }
  0x27   : > { %1112 = vrot.lane.b32.xlu1 %v3273_v52, %s3109_s20  ;;  %494 = vst.msk [vmem:[#allocation2 + $0x80] sm:$0xff] %vm476_vm1, %v358_v60  ;;  %511 = vst.msk [vmem:[#allocation2 + $0x108] sm:$0xff] %vm476_vm1, %v453_v3  ;;  %v3315_v6 = vld [vmem:[#allocation2 + $0x38] sm:$0xff]  ;;  %2908 = vmatprep.subr.mxu0 %v2112_v4  ;;  %v2110_v9 = vld [vmem:[%s4667_s1 + $0x8] sm:$0xff]  ;;  %s2750_s16 = scalar_lea.sflag [#allocation4], %s269_s13 }
  0x28   : > { %1110 = vrot.lane.b32.xlu0 %v3271_v51, %s3109_s20  ;;  %v758_v7 = vld [vmem:[#allocation2 + $0x31] sm:$0xff]  ;;  %2977 = vmatprep.subr.mxu1 %v2112_v4  ;;  %v2109_v10 = vld [vmem:[%s4667_s1] sm:$0xff]  ;;  %v297_v13 = vld [vmem:[%s3219_s17 + $0xa8] sm:$0xff] }
  0x29   : > { %2909 = vmatpush3.msra.mxu0 %v2112_v4  ;;  %2982 = vmatpush3.msra.mxu1 %v2112_v4  ;;  %v759_v11 = vld [vmem:[#allocation2 + $0x39] sm:$0xff]  ;;  %v375_v14 = vrot.slane %v297_v13, 7  ;;  %v3345_v17 = vld [vmem:[#allocation2 + $0x48] sm:$0xff]  ;;  %v286_v18 = vld [vmem:[%s3219_s17 + $0x50] sm:$0xff] }
  0x2a   : > { %2910 = vmatprep.subr.mxu0 %v2111_v8  ;;  %2978 = vmatprep.subr.mxu1 %v2111_v8  ;;  %v790_v12 = vld [vmem:[#allocation2 + $0x32] sm:$0xff]  ;;  %v791_v16 = vld [vmem:[#allocation2 + $0x3a] sm:$0xff]  ;;  %v359_v19 = vrot.slane %v286_v18, 7  ;;  %v760_v23 = vld [vmem:[#allocation2 + $0x49] sm:$0xff] }
  0x2b   : > { %858 = vrot.lane.b32.xlu1 %v661_v55, %s3108_s19  ;;  %2911 = vmatpush3.msra.mxu0 %v2111_v8  ;;  %v376_v15 = vsel %vm341_vm0, %v374_v1, %v375_v14  ;;  %v470_v21 = vsel %vm341_vm0, %v375_v14, 0.0  ;;  %v3357_v22 = vld [vmem:[#allocation2 + $0x50] sm:$0xff]  ;;  %v287_v26 = vld [vmem:[%s3219_s17 + $0x58] sm:$0xff]  ;;  %v3377_v30 = vld [vmem:[#allocation2 + $0x60] sm:$0xff] }
  0x2c   : > { %1238 = vrot.lane.b32.xlu0 %v661_v55, %s3110_s21  ;;  %2983 = vmatpush3.msra.mxu1 %v2111_v8  ;;  %512 = vst.msk [vmem:[#allocation2 + $0x110] sm:$0xff] %vm476_vm1, %v376_v15  ;;  %v448_v20 = vsel %vm341_vm0, 0.0, %v359_v19  ;;  %v761_v24 = vld [vmem:[#allocation2 + $0x51] sm:$0xff]  ;;  %v360_v27 = vrot.slane %v287_v26, 7  ;;  %v582_v34 = vld [vmem:[#allocation2 + $0xd9] sm:$0xff]  ;;  %v3388_v36 = vld [vmem:[#allocation2 + $0x68] sm:$0xff] }
  0x2d   : > { %2912 = vmatprep.subr.mxu0 %v2110_v9  ;;  %2979 = vmatprep.subr.mxu1 %v2110_v9  ;;  %496 = vst.msk [vmem:[#allocation2 + $0x90] sm:$0xff] %vm476_vm1, %v448_v20  ;;  %v792_v25 = vld [vmem:[#allocation2 + $0x4a] sm:$0xff]  ;;  %v793_v29 = vld [vmem:[#allocation2 + $0x52] sm:$0xff]  ;;  %v762_v37 = vld [vmem:[#allocation2 + $0x61] sm:$0xff] }
  0x2e   : > { %2913 = vmatpush3.msra.mxu0 %v2110_v9  ;;  %2984 = vmatpush3.msra.mxu1 %v2110_v9  ;;  %513 = vst.msk [vmem:[#allocation2 + $0x118] sm:$0x3] %vm479_vm2, %v470_v21  ;;  %v361_v28 = vsel %vm341_vm0, %v359_v19, %v360_v27  ;;  %v298_v31 = vld [vmem:[%s3219_s17 + $0xb0] sm:$0xff]  ;;  %v465_v35 = vsel %vm341_vm0, %v360_v27, 0.0  ;;  %v583_v38 = vld [vmem:[#allocation2 + $0xe1] sm:$0xff]  ;;  %v299_v40 = vld [vmem:[%s3219_s17 + $0xb8] sm:$0xff] }
  0x2f   : > { %1366 = vrot.lane.b32.xlu1 %v693_v57, %s3111_s22  ;;  %2914 = vmatprep.subr.mxu0 %v2109_v10  ;;  %497 = vst.msk [vmem:[#allocation2 + $0x98] sm:$0xff] %vm476_vm1, %v361_v28  ;;  %v377_v32 = vrot.slane %v298_v31, 7  ;;  %v614_v39 = vld [vmem:[#allocation2 + $0xda] sm:$0xff]  ;;  %v378_v41 = vrot.slane %v299_v40, 7  ;;  %v763_v43 = vld [vmem:[#allocation2 + $0x69] sm:$0xff]  ;;  %v679_v1 = vld [vmem:[#allocation2 + $0xf1] sm:$0xff] }
  0x30   : > { %1240 = vrot.lane.b32.xlu0 %v662_v56, %s3110_s21  ;;  %2980 = vmatprep.subr.mxu1 %v2109_v10  ;;  %498 = vst.msk [vmem:[#allocation2 + $0xa0] sm:$0x3] %vm479_vm2, %v465_v35  ;;  %v794_v44 = vld [vmem:[#allocation2 + $0x62] sm:$0xff]  ;;  %v3407_v46 = vld [vmem:[#allocation2 + $0xf0] sm:$0xff]  ;;  %v3426_v60 = vld [vmem:[#allocation2 + $0xf8] sm:$0xff] }
  0x31   : > { %2915 = vmatpush3.msra.mxu0 %v2109_v10  ;;  %2985 = vmatpush3.msra.mxu1 %v2109_v10  ;;  %v454_v33 = vsel %vm341_vm0, 0.0, %v377_v32  ;;  %v379_v42 = vsel %vm341_vm0, %v377_v32, %v378_v41  ;;  %v615_v45 = vld [vmem:[#allocation2 + $0xe2] sm:$0xff]  ;;  %v471_v59 = vsel %vm341_vm0, %v378_v41, 0.0  ;;  %v732_v4 = vld [vmem:[#allocation2 + $0x78] sm:$0xff] }
  0x32   : > { %2964 = vmatprep.subr.mxu1 %v3106_v0  ;;  %514 = vst.msk [vmem:[#allocation2 + $0x120] sm:$0xff] %vm476_vm1, %v454_v33  ;;  %515 = vst.msk [vmem:[#allocation2 + $0x128] sm:$0xff] %vm476_vm1, %v379_v42  ;;  %v288_v49 = vld [vmem:[%s3219_s17 + $0x60] sm:$0xff]  ;;  %v289_v5 = vld [vmem:[%s3219_s17 + $0x68] sm:$0xff] }
  0x33   : > { %986 = vrot.lane.b32.xlu1 %v693_v57, %s3107_s18  ;;  %v362_v54 = vrot.slane %v288_v49, 7  ;;  %516 = vst.msk [vmem:[#allocation2 + $0x130] sm:$0x3] %vm479_vm2, %v471_v59  ;;  %v363_v9 = vrot.slane %v289_v5, 7  ;;  %v680_v13 = vld [vmem:[#allocation2 + $0xf9] sm:$0xff]  ;;  %v533_v32 = vld [vmem:[#allocation2 + $0x8] sm:$0xff] }
  0x34   : > { %860 = vrot.lane.b32.xlu0 %v662_v56, %s3108_s19  ;;  %v795_v56 = vld [vmem:[#allocation2 + $0x6a] sm:$0xff]  ;;  %v711_v14 = vld [vmem:[#allocation2 + $0xf2] sm:$0xff]  ;;  %v532_v18 = vld [vmem:[#allocation2] sm:$0xff] }
  0x35   : > { %v449_v55 = vsel %vm341_vm0, 0.0, %v362_v54  ;;  %v364_v10 = vsel %vm341_vm0, %v362_v54, %v363_v9  ;;  %v733_v19 = vld [vmem:[#allocation2 + $0x80] sm:$0xff] }
  0x36   : > { %499 = vst.msk [vmem:[#allocation2 + $0xa8] sm:$0xff] %vm476_vm1, %v449_v55  ;;  %500 = vst.msk [vmem:[#allocation2 + $0xb0] sm:$0xff] %vm476_vm1, %v364_v10  ;;  %v764_v20 = vld [vmem:[#allocation2 + $0x79] sm:$0xff] }
  0x37   : > { %1494 = vrot.lane.b32.xlu1 %v3292_v62, %s3112_s23  ;;  %v300_v26 = vld [vmem:[%s3219_s17 + $0xc0] sm:$0xff] }
  0x38   : > { %1368 = vrot.lane.b32.xlu0 %v694_v61, %s3111_s22  ;;  %v380_v31 = vrot.slane %v300_v26, 7 }
  0x3a   : > { %v455_v35 = vsel %vm341_vm0, 0.0, %v380_v31 }
  0x3b   : > { %1114 = vrot.lane.b32.xlu1 %v3292_v62, %s3109_s20  ;;  %517 = vst.msk [vmem:[#allocation2 + $0x138] sm:$0xff] %vm476_vm1, %v455_v35 }
  0x3c   : > { %988 = vrot.lane.b32.xlu0 %v694_v61, %s3107_s18 }
  0x3f   : > { %1622 = vrot.lane.b32.xlu1 %v758_v7, %s3113_s8 }
  0x40   : > { %1496 = vrot.lane.b32.xlu0 %v3315_v6, %s3112_s23 }
  0x43   : > { %1242 = vrot.lane.b32.xlu1 %v758_v7, %s3110_s21 }
  0x44   : > { %1116 = vrot.lane.b32.xlu0 %v3315_v6, %s3109_s20 }
  0x47   : > { %1750 = vrot.lane.b32.xlu1 %v790_v12, %s3114_s14 }
  0x48   : > { %1624 = vrot.lane.b32.xlu0 %v759_v11, %s3113_s8 }
  0x4b   : > { %1244 = vrot.lane.b32.xlu1 %v759_v11, %s3110_s21 }
  0x4c   : > { %862 = vrot.lane.b32.xlu0 %v758_v7, %s3108_s19 }
  0x4f   : > { %1752 = vrot.lane.b32.xlu1 %v791_v16, %s3114_s14 }
  0x50   : > { %1370 = vrot.lane.b32.xlu0 %v790_v12, %s3111_s22 }
  0x53   : > { %990 = vrot.lane.b32.xlu1 %v790_v12, %s3107_s18 }
  0x54   : > { %864 = vrot.lane.b32.xlu0 %v759_v11, %s3108_s19 }
  0x57   : > { %1498 = vrot.lane.b32.xlu1 %v3345_v17, %s3112_s23 }
  0x58   : > { %1372 = vrot.lane.b32.xlu0 %v791_v16, %s3111_s22 }
  0x5b   : > { %1118 = vrot.lane.b32.xlu1 %v3345_v17, %s3109_s20 }
  0x5c   : > { %992 = vrot.lane.b32.xlu0 %v791_v16, %s3107_s18 }
  0x5f   : > { %1626 = vrot.lane.b32.xlu1 %v760_v23, %s3113_s8 }
  0x60   : > { %1500 = vrot.lane.b32.xlu0 %v3357_v22, %s3112_s23 }
  0x63   : > { %1246 = vrot.lane.b32.xlu1 %v760_v23, %s3110_s21 }
  0x64   : > { %1120 = vrot.lane.b32.xlu0 %v3357_v22, %s3109_s20 }
  0x67   : > { %1754 = vrot.lane.b32.xlu1 %v792_v25, %s3114_s14 }
  0x68   : > { %1628 = vrot.lane.b32.xlu0 %v761_v24, %s3113_s8 }
  0x6b   : > { %1248 = vrot.lane.b32.xlu1 %v761_v24, %s3110_s21 }
  0x6c   : > { %866 = vrot.lane.b32.xlu0 %v760_v23, %s3108_s19 }
  0x6f   : > { %1756 = vrot.lane.b32.xlu1 %v793_v29, %s3114_s14 }
  0x70   : > { %1374 = vrot.lane.b32.xlu0 %v792_v25, %s3111_s22 }
  0x73   : > { %994 = vrot.lane.b32.xlu1 %v792_v25, %s3107_s18 }
  0x74   : > { %868 = vrot.lane.b32.xlu0 %v761_v24, %s3108_s19 }
  0x77   : > { %1502 = vrot.lane.b32.xlu1 %v3377_v30, %s3112_s23 }
  0x78   : > { %1376 = vrot.lane.b32.xlu0 %v793_v29, %s3111_s22 }
  0x7b   : > { %996 = vrot.lane.b32.xlu1 %v793_v29, %s3107_s18 }
  0x7c   : > { %890 = vrot.lane.b32.xlu0 %v582_v34, %s3108_s19 }
  0x7f   : > { %1504 = vrot.lane.b32.xlu1 %v3388_v36, %s3112_s23 }
  0x80   : > { %1122 = vrot.lane.b32.xlu0 %v3377_v30, %s3109_s20 }
  0x83   : > { %892 = vrot.lane.b32.xlu1 %v583_v38, %s3108_s19 }
  0x84   : > { %1630 = vrot.lane.b32.xlu0 %v762_v37, %s3113_s8 }
  0x87   : > { %1124 = vrot.lane.b32.xlu1 %v3388_v36, %s3109_s20 }
  0x88   : > { %1018 = vrot.lane.b32.xlu0 %v614_v39, %s3107_s18 }
  0x8b   : > { %1632 = vrot.lane.b32.xlu1 %v763_v43, %s3113_s8 }
  0x8c   : > { %1250 = vrot.lane.b32.xlu0 %v762_v37, %s3110_s21 }
  0x8f   : > { %870 = vrot.lane.b32.xlu1 %v762_v37, %s3108_s19 }
  0x90   : > { %1758 = vrot.lane.b32.xlu0 %v794_v44, %s3114_s14 }
  0x91   : > { %v983_v47 = vpop.permute.xlu1 %982 }
  0x92   : > { %v855_v48 = vpop.permute.xlu0 %854 }
  0x93   : > { %1146 = vrot.lane.b32.xlu1 %v3407_v46, %s3109_s20  ;;  %v1846_v21 = vsel %vm476_vm1, %v532_v18, %v855_v48  ;;  %v776_v18 = vld [vmem:[#allocation2 + $0x109] sm:$0xff] }
  0x94   : > { %1020 = vrot.lane.b32.xlu0 %v615_v45, %s3107_s18  ;;  %v1879_v25 = vsel %vm1878_vm4, %v1846_v21, %v983_v47  ;;  %v712_v45 = vld [vmem:[#allocation2 + $0xfa] sm:$0xff]  ;;  %v744_v47 = vld [vmem:[#allocation2 + $0x108] sm:$0xff] }
  0x95   : > { %v3413_v50 = vpop.permute.xlu1 %984 }
  0x96   : > { %v3415_v53 = vpop.permute.xlu0 %856 }
  0x97   : > { %1378 = vrot.lane.b32.xlu1 %v794_v44, %s3111_s22  ;;  %v1847_v38 = vsel %vm476_vm1, %v533_v32, %v3415_v53 }
  0x98   : > { %1252 = vrot.lane.b32.xlu0 %v763_v43, %s3110_s21 }
  0x99   : > { %v3421_v58 = vpop.permute.xlu1 %1112 }
  0x9a   : > { %v1111_v57 = vpop.permute.xlu0 %1110 }
  0x9b   : > { %872 = vrot.lane.b32.xlu1 %v763_v43, %s3108_s19  ;;  %v1912_v27 = vsel %vm1911_vm5, %v1879_v25, %v1111_v57  ;;  %v466_v43 = vsel %vm341_vm0, %v363_v9, 0.0  ;;  %v796_v57 = vld [vmem:[#allocation2 + $0x7a] sm:$0xff]  ;;  %v290_v25 = vld [vmem:[%s3219_s17 + $0x70] sm:$0xff] }
  0x9c   : > { %1760 = vrot.lane.b32.xlu0 %v795_v56, %s3114_s14  ;;  %501 = vst.msk [vmem:[#allocation2 + $0xb8] sm:$0x3] %vm479_vm2, %v466_v43  ;;  %v365_v32 = vrot.slane %v290_v25, 7 }
  0x9d   : > { %v3429_v63 = vpop.permute.xlu1 %858 }
  0x9e   : > { %v1239_v61 = vpop.permute.xlu0 %1238 }
  0x9f   : > { %1148 = vrot.lane.b32.xlu1 %v3426_v60, %s3109_s20  ;;  %v1945_v33 = vsel %vm1944_vm6, %v1912_v27, %v1239_v61 }
  0xa0   : > { %998 = vrot.lane.b32.xlu0 %v794_v44, %s3107_s18  ;;  %v1880_v44 = vsel %vm1878_vm4, %v1847_v38, %v3413_v50 }
  0xa1   : > { %v1367_v3 = vpop.permute.xlu1 %1366  ;;  %v1913_v48 = vsel %vm1911_vm5, %v1880_v44, %v3421_v58  ;;  %v777_v44 = vld [vmem:[#allocation2 + $0x111] sm:$0xff] }
  0xa2   : > { %v3434_v2 = vpop.permute.xlu0 %1240  ;;  %v1978_v34 = vsel %vm1977_vm7, %v1945_v33, %v1367_v3 }
  0xa3   : > { %1380 = vrot.lane.b32.xlu1 %v795_v56, %s3111_s22  ;;  %v1946_v54 = vsel %vm1944_vm6, %v1913_v48, %v3434_v2  ;;  %v301_v2 = vld [vmem:[%s3219_s17 + $0xc8] sm:$0xff] }
  0xa4   : > { %1274 = vrot.lane.b32.xlu0 %v679_v1, %s3110_s21  ;;  %v381_v5 = vrot.slane %v301_v2, 7 }
  0xa5   : > { %v3441_v8 = vpop.permute.xlu1 %986 }
  0xa6   : > { %v3439_v7 = vpop.permute.xlu0 %860  ;;  %v382_v9 = vsel %vm341_vm0, %v380_v31, %v381_v5  ;;  %v472_v38 = vsel %vm341_vm0, %v381_v5, 0.0  ;;  %v766_v5 = vld [vmem:[#allocation2 + $0x91] sm:$0xff] }
  0xa7   : > { %894 = vrot.lane.b32.xlu1 %v679_v1, %s3108_s19  ;;  %518 = vst.msk [vmem:[#allocation2 + $0x140] sm:$0xff] %vm476_vm1, %v382_v9  ;;  %v809_v9 = vld [vmem:[#allocation2 + $0x112] sm:$0xff] }
  0xa8   : > { %1506 = vrot.lane.b32.xlu0 %v732_v4, %s3112_s23  ;;  %519 = vst.msk [vmem:[#allocation2 + $0x148] sm:$0x3] %vm479_vm2, %v472_v38 }
  0xa9   : > { %v1495_v12 = vpop.permute.xlu1 %1494 }
  0xaa   : > { %v1369_v11 = vpop.permute.xlu0 %1368  ;;  %v2011_v37 = vsel %vm2010_vm8, %v1978_v34, %v1495_v12  ;;  %v745_v12 = vld [vmem:[#allocation2 + $0x110] sm:$0xff] }
  0xab   : > { %1126 = vrot.lane.b32.xlu1 %v732_v4, %s3109_s20  ;;  %v1979_v55 = vsel %vm1977_vm7, %v1946_v54, %v1369_v11 }
  0xac   : > { %1000 = vrot.lane.b32.xlu0 %v795_v56, %s3107_s18  ;;  %v765_v56 = vld [vmem:[#allocation2 + $0x81] sm:$0xff] }
  0xad   : > { %v3451_v16 = vpop.permute.xlu1 %1114 }
  0xae   : > { %v3449_v15 = vpop.permute.xlu0 %988 }
  0xaf   : > { %1402 = vrot.lane.b32.xlu1 %v711_v14, %s3111_s22 }
  0xb0   : > { %1276 = vrot.lane.b32.xlu0 %v680_v13, %s3110_s21 }
  0xb1   : > { %v1623_v24 = vpop.permute.xlu1 %1622 }
  0xb2   : > { %v1497_v23 = vpop.permute.xlu0 %1496  ;;  %v2044_v39 = vsel %vm2043_vm9, %v2011_v37, %v1623_v24 }
  0xb3   : > { %1634 = vrot.lane.b32.xlu1 %v764_v20, %s3113_s8  ;;  %v2012_v50 = vsel %vm2010_vm8, %v1979_v55, %v1497_v23  ;;  %v1848_v23 = vsel %vm476_vm1, %v3271_v51, %v3429_v63  ;;  %v450_v63 = vsel %vm341_vm0, 0.0, %v365_v32 }
  0xb4   : > { %1508 = vrot.lane.b32.xlu0 %v733_v19, %s3112_s23  ;;  %v1881_v24 = vsel %vm1878_vm4, %v1848_v23, %v3441_v8  ;;  %502 = vst.msk [vmem:[#allocation2 + $0xc0] sm:$0xff] %vm476_vm1, %v450_v63 }
  0xb5   : > { %v3463_v29 = vpop.permute.xlu1 %1242  ;;  %v1914_v26 = vsel %vm1911_vm5, %v1881_v24, %v3451_v16 }
  0xb6   : > { %v3461_v28 = vpop.permute.xlu0 %1116  ;;  %v1947_v33 = vsel %vm1944_vm6, %v1914_v26, %v3463_v29  ;;  %v1849_v29 = vsel %vm476_vm1, %v3273_v52, %v3439_v7 }
  0xb7   : > { %1022 = vrot.lane.b32.xlu1 %v711_v14, %s3107_s18 }
  0xb8   : > { %896 = vrot.lane.b32.xlu0 %v680_v13, %s3108_s19 }
  0xb9   : > { %v1751_v41 = vpop.permute.xlu1 %1750 }
  0xba   : > { %v1625_v40 = vpop.permute.xlu0 %1624  ;;  %v2077_v42 = vsel %vm2076_vm10, %v2044_v39, %v1751_v41  ;;  %v1882_v39 = vsel %vm1878_vm4, %v1849_v29, %v3449_v15 }
  0xbb   : > { %1254 = vrot.lane.b32.xlu1 %v764_v20, %s3110_s21  ;;  %2916 = vmatprep.mubr.msk.f32.mxu0 %vm2121_vm11, %v2077_v42  ;;  %v2045_v58 = vsel %vm2043_vm9, %v2012_v50, %v1625_v40  ;;  %v734_v40 = vld [vmem:[#allocation2 + $0x90] sm:$0xff]  ;;  %v1915_v41 = vsel %vm1911_vm5, %v1882_v39, %v3461_v28 }
  0xbc   : > { %1128 = vrot.lane.b32.xlu0 %v733_v19, %s3109_s20  ;;  %v797_v19 = vld [vmem:[#allocation2 + $0x82] sm:$0xff] }
  0xbd   : > { %v3487_v53 = vpop.permute.xlu1 %1244 }
  0xbe   : > { %v3485_v49 = vpop.permute.xlu0 %862  ;;  %v1948_v7 = vsel %vm1944_vm6, %v1915_v41, %v3487_v53  ;;  %v291_v53 = vld [vmem:[%s3219_s17 + $0x78] sm:$0xff] }
  0xbf   : > { %1530 = vrot.lane.b32.xlu1 %v744_v47, %s3112_s23  ;;  %v1850_v25 = vsel %vm476_vm1, %v3292_v62, %v3485_v49 }
  0xc0   : > { %1404 = vrot.lane.b32.xlu0 %v712_v45, %s3111_s22 }
  0xc1   : > { %v1753_v61 = vpop.permute.xlu1 %1752 }
  0xc2   : > { %v1371_v59 = vpop.permute.xlu0 %1370  ;;  %v2078_v1 = vsel %vm2076_vm10, %v2045_v58, %v1753_v61  ;;  %v735_v61 = vld [vmem:[#allocation2 + $0x98] sm:$0xff] }
  0xc3   : > { %1762 = vrot.lane.b32.xlu1 %v796_v57, %s3114_s14  ;;  %2917 = vmatmul.mubr.msk.f32.vlgmr.msra.gmra.mxu0 %vm2121_vm11, %v2078_v1  ;;  %v1980_v51 = vsel %vm1977_vm7, %v1947_v33, %v1371_v59  ;;  %v746_v33 = vld [vmem:[#allocation2 + $0x120] sm:$0xff] }
  0xc4   : > { %1636 = vrot.lane.b32.xlu0 %v765_v56, %s3113_s8 }
  0xc5   : > { %v3503_v4 = vpop.permute.xlu1 %990 }
  0xc6   : > { %v3501_v3 = vpop.permute.xlu0 %864 }
  0xc7   : > { %1024 = vrot.lane.b32.xlu1 %v712_v45, %s3107_s18  ;;  %v808_v45 = vld [vmem:[#allocation2 + $0x10a] sm:$0xff]  ;;  %v1851_v41 = vsel %vm476_vm1, %v3315_v6, %v3501_v3 }
  0xc8   : > { %874 = vrot.lane.b32.xlu0 %v764_v20, %s3108_s19 }
  0xc9   : > { %v1499_v11 = vpop.permute.xlu1 %1498 }
  0xca   : > { %v1373_v10 = vpop.permute.xlu0 %1372  ;;  %v2013_v8 = vsel %vm2010_vm8, %v1980_v51, %v1499_v11 }
  0xcb   : > { %1256 = vrot.lane.b32.xlu1 %v765_v56, %s3110_s21  ;;  %v1981_v43 = vsel %vm1977_vm7, %v1948_v7, %v1373_v10 }
  0xcc   : > { %1150 = vrot.lane.b32.xlu0 %v744_v47, %s3109_s20 }
  0xcd   : > { %v3513_v14 = vpop.permute.xlu1 %1118 }
  0xce   : > { %v3511_v13 = vpop.permute.xlu0 %992 }
  0xcf   : > { %1532 = vrot.lane.b32.xlu1 %v745_v12, %s3112_s23 }
  0xd0   : > { %1382 = vrot.lane.b32.xlu0 %v796_v57, %s3111_s22 }
  0xd1   : > { %v1627_v21 = vpop.permute.xlu1 %1626 }
  0xd2   : > { %v1501_v20 = vpop.permute.xlu0 %1500  ;;  %v2046_v16 = vsel %vm2043_vm9, %v2013_v8, %v1627_v21 }
  0xd3   : > { %1764 = vrot.lane.b32.xlu1 %v797_v19, %s3114_s14  ;;  %v2014_v15 = vsel %vm2010_vm8, %v1981_v43, %v1501_v20  ;;  %v1884_v43 = vsel %vm1878_vm4, %v1851_v41, %v3511_v13  ;;  %v304_v41 = vld [vmem:[%s3219_s17 + $0xe0] sm:$0xff] }
  0xd4   : > { %1658 = vrot.lane.b32.xlu0 %v776_v18, %s3113_s8 }
  0xd5   : > { %v3529_v31 = vpop.permute.xlu1 %1246 }
  0xd6   : > { %v3527_v27 = vpop.permute.xlu0 %1120 }
  0xd7   : > { %1002 = vrot.lane.b32.xlu1 %v796_v57, %s3107_s18 }
  0xd8   : > { %876 = vrot.lane.b32.xlu0 %v765_v56, %s3108_s19  ;;  %v366_v56 = vrot.slane %v291_v53, 7  ;;  %v799_v53 = vld [vmem:[#allocation2 + $0x9a] sm:$0xff] }
  0xd9   : > { %v1755_v35 = vpop.permute.xlu1 %1754 }
  0xda   : > { %v1629_v34 = vpop.permute.xlu0 %1628  ;;  %v2079_v37 = vsel %vm2076_vm10, %v2046_v16, %v1755_v35  ;;  %v367_v57 = vsel %vm341_vm0, %v365_v32, %v366_v56  ;;  %v467_v26 = vsel %vm341_vm0, %v366_v56, 0.0  ;;  %v1883_v32 = vsel %vm1878_vm4, %v1850_v25, %v3503_v4  ;;  %v767_v16 = vld [vmem:[#allocation2 + $0x99] sm:$0xff] }
  0xdb   : > { %1278 = vrot.lane.b32.xlu1 %v776_v18, %s3110_s21  ;;  %2919 = vmatprep.mubr.msk.f32.mxu0 %vm2121_vm11, %v2079_v37  ;;  %v2047_v28 = vsel %vm2043_vm9, %v2014_v15, %v1629_v34  ;;  %503 = vst.msk [vmem:[#allocation2 + $0xc8] sm:$0xff] %vm476_vm1, %v367_v57  ;;  %v1916_v51 = vsel %vm1911_vm5, %v1883_v32, %v3513_v14  ;;  %v798_v34 = vld [vmem:[#allocation2 + $0x92] sm:$0xff] }
  0xdc   : > { %1152 = vrot.lane.b32.xlu0 %v745_v12, %s3109_s20  ;;  %v302_v12 = vld [vmem:[%s3219_s17 + $0xd0] sm:$0xff]  ;;  %504 = vst.msk [vmem:[#allocation2 + $0xd0] sm:$0x3] %vm479_vm2, %v467_v26  ;;  %v1949_v62 = vsel %vm1944_vm6, %v1916_v51, %v3529_v31  ;;  %v303_v31 = vld [vmem:[%s3219_s17 + $0xd8] sm:$0xff]  ;;  %v1917_v15 = vsel %vm1911_vm5, %v1884_v43, %v3527_v27 }
  0xdd   : > { %v3555_v52 = vpop.permute.xlu1 %1248  ;;  %v383_v20 = vrot.slane %v302_v12, 7 }
  0xde   : > { %v3553_v42 = vpop.permute.xlu0 %866  ;;  %v1950_v6 = vsel %vm1944_vm6, %v1917_v15, %v3555_v52  ;;  %v778_v52 = vld [vmem:[#allocation2 + $0x121] sm:$0xff]  ;;  %v386_v15 = vrot.slane %v304_v41, 7 }
  0xdf   : > { %1510 = vrot.lane.b32.xlu1 %v734_v40, %s3112_s23  ;;  %v456_v21 = vsel %vm341_vm0, 0.0, %v383_v20 }
  0xe0   : > { %1384 = vrot.lane.b32.xlu0 %v797_v19, %s3111_s22  ;;  %520 = vst.msk [vmem:[#allocation2 + $0x150] sm:$0xff] %vm476_vm1, %v456_v21  ;;  %v810_v21 = vld [vmem:[#allocation2 + $0x122] sm:$0xff] }
  0xe1   : > { %v1757_v48 = vpop.permute.xlu1 %1756 }
  0xe2   : > { %v1375_v47 = vpop.permute.xlu0 %1374  ;;  %v2080_v54 = vsel %vm2076_vm10, %v2047_v28, %v1757_v48  ;;  %v747_v28 = vld [vmem:[#allocation2 + $0x128] sm:$0xff] }
  0xe3   : > { %1786 = vrot.lane.b32.xlu1 %v808_v45, %s3114_s14  ;;  %2920 = vmatmul.mubr.msk.f32.gmra.mxu0 %vm2121_vm11, %v2080_v54  ;;  %v1982_v49 = vsel %vm1977_vm7, %v1949_v62, %v1375_v47  ;;  %v3704_v62 = vld [vmem:[#allocation2 + $0xb0] sm:$0xff] }
  0xe4   : > { %1660 = vrot.lane.b32.xlu0 %v777_v44, %s3113_s8 }
  0xe5   : > { %v3571_v50 = vpop.permute.xlu1 %994 }
  0xe6   : > { %v3569_v55 = vpop.permute.xlu0 %868 }
  0xe7   : > { %1004 = vrot.lane.b32.xlu1 %v797_v19, %s3107_s18 }
  0xe8   : > { %898 = vrot.lane.b32.xlu0 %v776_v18, %s3108_s19 }
  0xe9   : > { %v1503_v59 = vpop.permute.xlu1 %1502 }
  0xea   : > { %v3577_v58 = vpop.permute.xlu0 %1376  ;;  %v2015_v4 = vsel %vm2010_vm8, %v1982_v49, %v1503_v59 }
  0xeb   : > { %1280 = vrot.lane.b32.xlu1 %v777_v44, %s3110_s21  ;;  %v1983_v3 = vsel %vm1977_vm7, %v1950_v6, %v3577_v58 }
  0xec   : > { %1130 = vrot.lane.b32.xlu0 %v734_v40, %s3109_s20  ;;  %v384_v40 = vrot.slane %v303_v31, 7 }
  0xed   : > { %v3583_v2 = vpop.permute.xlu1 %996 }
  0xee   : > { %v3581_v1 = vpop.permute.xlu0 %890  ;;  %v385_v7 = vsel %vm341_vm0, %v383_v20, %v384_v40  ;;  %v779_v20 = vld [vmem:[#allocation2 + $0x129] sm:$0xff] }
  0xef   : > { %1512 = vrot.lane.b32.xlu1 %v735_v61, %s3112_s23  ;;  %521 = vst.msk [vmem:[#allocation2 + $0x158] sm:$0xff] %vm476_vm1, %v385_v7 }
  0xf0   : > { %1406 = vrot.lane.b32.xlu0 %v808_v45, %s3111_s22 }
  0xf1   : > { %v1505_v11 = vpop.permute.xlu1 %1504 }
  0xf2   : > { %v3587_v10 = vpop.permute.xlu0 %1122  ;;  %v2016_v13 = vsel %vm2010_vm8, %v1983_v3, %v1505_v11  ;;  %v3679_v11 = vld [vmem:[#allocation2 + $0xa8] sm:$0xff] }
  0xf3   : > { %1788 = vrot.lane.b32.xlu1 %v809_v9, %s3114_s14 }
  0xf4   : > { %1638 = vrot.lane.b32.xlu0 %v766_v5, %s3113_s8 }
  0xf5   : > { %v3592_v19 = vpop.permute.xlu1 %892 }
  0xf6   : > { %v1631_v18 = vpop.permute.xlu0 %1630 }
  0xf7   : > { %1026 = vrot.lane.b32.xlu1 %v808_v45, %s3107_s18  ;;  %v2048_v35 = vsel %vm2043_vm9, %v2015_v4, %v1631_v18 }
  0xf8   : > { %900 = vrot.lane.b32.xlu0 %v777_v44, %s3108_s19 }
  0xf9   : > { %v3600_v24 = vpop.permute.xlu1 %1124 }
  0xfa   : > { %v3598_v23 = vpop.permute.xlu0 %1018 }
  0xfb   : > { %1258 = vrot.lane.b32.xlu1 %v766_v5, %s3110_s21 }
  0xfc   : > { %1132 = vrot.lane.b32.xlu0 %v735_v61, %s3109_s20 }
  0xfd   : > { %v1633_v8 = vpop.permute.xlu1 %1632 }
  0xfe   : > { %v3613_v63 = vpop.permute.xlu0 %1250  ;;  %v2049_v47 = vsel %vm2043_vm9, %v2016_v13, %v1633_v8  ;;  %v3746_v13 = vld [vmem:[#allocation2 + $0x138] sm:$0xff] }
  0xff   : > { %1534 = vrot.lane.b32.xlu1 %v746_v33, %s3112_s23 }
 0x100   : > { %1408 = vrot.lane.b32.xlu0 %v809_v9, %s3111_s22 }
 0x101   : > { %v3622_v37 = vpop.permute.xlu1 %870 }
 0x102   : > { %v1759_v14 = vpop.permute.xlu0 %1758 }
 0x103   : > { %v2081_v29 = vsel %vm2076_vm10, %v2048_v35, %v1759_v14  ;;  %1766 = vrot.lane.b32.xlu1 %v798_v34, %s3114_s14  ;;  %v768_v35 = vld [vmem:[#allocation2 + $0xa9] sm:$0xff] }
 0x104   : > { %1640 = vrot.lane.b32.xlu0 %v767_v16, %s3113_s8  ;;  %2922 = vmatprep.mubr.msk.f32.mxu0 %vm2121_vm11, %v2081_v29  ;;  %v811_v14 = vld [vmem:[#allocation2 + $0x12a] sm:$0xff] }
 0x105   : > { %v3631_v39 = vpop.permute.xlu1 %1146 }
 0x106   : > { %v3629_v38 = vpop.permute.xlu0 %1020 }
 0x107   : > { %1028 = vrot.lane.b32.xlu1 %v809_v9, %s3107_s18  ;;  %v473_v9 = vsel %vm341_vm0, %v384_v40, 0.0 }
 0x108   : > { %878 = vrot.lane.b32.xlu0 %v766_v5, %s3108_s19  ;;  %522 = vst.msk [vmem:[#allocation2 + $0x160] sm:$0x3] %vm479_vm2, %v473_v9 }
 0x109   : > { %v3646_v45 = vpop.permute.xlu1 %1378 }
 0x10a   : > { %v3644_v44 = vpop.permute.xlu0 %1252 }
 0x10b   : > { %1260 = vrot.lane.b32.xlu1 %v767_v16, %s3110_s21 }
 0x10c   : > { %1154 = vrot.lane.b32.xlu0 %v746_v33, %s3109_s20 }
 0x10d   : > { %v3656_v48 = vpop.permute.xlu1 %872 }
 0x10e   : > { %v1761_v27 = vpop.permute.xlu0 %1760 }
 0x10f   : > { %v2082_v54 = vsel %vm2076_vm10, %v2049_v47, %v1761_v27  ;;  %1536 = vrot.lane.b32.xlu1 %v747_v28, %s3112_s23  ;;  %v1853_v27 = vsel %vm476_vm1, %v3357_v22, %v3569_v55 }
 0x110   : > { %1386 = vrot.lane.b32.xlu0 %v798_v34, %s3111_s22  ;;  %2923 = vmatmul.mubr.msk.f32.gmra.mxu0 %vm2121_vm11, %v2082_v54  ;;  %v1886_v54 = vsel %vm1878_vm4, %v1853_v27, %v3583_v2 }
 0x111   : > { %v3664_v57 = vpop.permute.xlu1 %1148 }
 0x112   : > { %v3662_v56 = vpop.permute.xlu0 %998 }
 0x113   : > { %1768 = vrot.lane.b32.xlu1 %v799_v53, %s3114_s14 }
 0x114   : > { %1662 = vrot.lane.b32.xlu0 %v778_v52, %s3113_s8 }
 0x115   : > { %v3670_v59 = vpop.permute.xlu1 %1380 }
 0x116   : > { %v3668_v58 = vpop.permute.xlu0 %1274 }
 0x117   : > { %1006 = vrot.lane.b32.xlu1 %v798_v34, %s3107_s18 }
 0x118   : > { %880 = vrot.lane.b32.xlu0 %v767_v16, %s3108_s19  ;;  %v1852_v16 = vsel %vm476_vm1, %v3345_v17, %v3553_v42 }
 0x119   : > { %v3674_v5 = vpop.permute.xlu1 %894  ;;  %v1885_v34 = vsel %vm1878_vm4, %v1852_v16, %v3571_v50 }
 0x11a   : > { %v1507_v61 = vpop.permute.xlu0 %1506  ;;  %v1918_v29 = vsel %vm1911_vm5, %v1885_v34, %v3587_v10 }
 0x11b   : > { %1282 = vrot.lane.b32.xlu1 %v778_v52, %s3110_s21  ;;  %v1951_v17 = vsel %vm1944_vm6, %v1918_v29, %v3613_v63  ;;  %v457_v63 = vsel %vm341_vm0, 0.0, %v386_v15 }
 0x11c   : > { %1156 = vrot.lane.b32.xlu0 %v747_v28, %s3109_s20  ;;  %v1984_v42 = vsel %vm1977_vm7, %v1951_v17, %v3646_v45  ;;  %523 = vst.msk [vmem:[#allocation2 + $0x168] sm:$0xff] %vm476_vm1, %v457_v63  ;;  %v3788_v17 = vld [vmem:[#allocation2 + $0xd8] sm:$0xff] }
 0x11d   : > { %v3684_v18 = vpop.permute.xlu1 %1126  ;;  %v2017_v50 = vsel %vm2010_vm8, %v1984_v42, %v1507_v61  ;;  %v1919_v61 = vsel %vm1911_vm5, %v1886_v54, %v3600_v24 }
 0x11e   : > { %v3682_v12 = vpop.permute.xlu0 %1000  ;;  %v1952_v22 = vsel %vm1944_vm6, %v1919_v61, %v3644_v44 }
 0x11f   : > { %1514 = vrot.lane.b32.xlu1 %v3679_v11, %s3112_s23  ;;  %v1985_v55 = vsel %vm1977_vm7, %v1952_v22, %v3670_v59 }
 0x120   : > { %1388 = vrot.lane.b32.xlu0 %v799_v53, %s3111_s22 }
 0x121   : > { %v3691_v26 = vpop.permute.xlu1 %1402 }
 0x122   : > { %v3689_v25 = vpop.permute.xlu0 %1276 }
 0x123   : > { %1790 = vrot.lane.b32.xlu1 %v810_v21, %s3114_s14 }
 0x124   : > { %1664 = vrot.lane.b32.xlu0 %v779_v20, %s3113_s8 }
 0x125   : > { %v1635_v33 = vpop.permute.xlu1 %1634 }
 0x126   : > { %v1509_v32 = vpop.permute.xlu0 %1508  ;;  %v2050_v7 = vsel %vm2043_vm9, %v2017_v50, %v1635_v33  ;;  %v1864_v50 = vsel %vm476_vm1, %v3788_v17, %v3581_v1 }
 0x127   : > { %1008 = vrot.lane.b32.xlu1 %v799_v53, %s3107_s18  ;;  %v800_v53 = vld [vmem:[#allocation2 + $0xaa] sm:$0xff]  ;;  %v2018_v2 = vsel %vm2010_vm8, %v1985_v55, %v1509_v32  ;;  %v1897_v41 = vsel %vm1878_vm4, %v1864_v50, %v3598_v23  ;;  %v3834_v55 = vld [vmem:[#allocation2 + $0xc0] sm:$0xff] }
 0x128   : > { %902 = vrot.lane.b32.xlu0 %v778_v52, %s3108_s19  ;;  %v769_v52 = vld [vmem:[#allocation2 + $0xb1] sm:$0xff] }
 0x129   : > { %v3699_v8 = vpop.permute.xlu1 %1022 }
 0x12a   : > { %v3697_v51 = vpop.permute.xlu0 %896 }
 0x12b   : > { %1284 = vrot.lane.b32.xlu1 %v779_v20, %s3110_s21 }
 0x12c   : > { %1134 = vrot.lane.b32.xlu0 %v3679_v11, %s3109_s20 }
 0x12d   : > { %v3708_v4 = vpop.permute.xlu1 %1254 }
 0x12e   : > { %v3706_v49 = vpop.permute.xlu0 %1128 }
 0x12f   : > { %1516 = vrot.lane.b32.xlu1 %v3704_v62, %s3112_s23 }
 0x130   : > { %1410 = vrot.lane.b32.xlu0 %v810_v21, %s3111_s22 }
 0x131   : > { %v3722_v40 = vpop.permute.xlu1 %1530 }
 0x132   : > { %v3720_v31 = vpop.permute.xlu0 %1404 }
 0x133   : > { %1792 = vrot.lane.b32.xlu1 %v811_v14, %s3114_s14 }
 0x134   : > { %1642 = vrot.lane.b32.xlu0 %v768_v35, %s3113_s8 }
 0x135   : > { %v1763_v43 = vpop.permute.xlu1 %1762 }
 0x136   : > { %v1637_v10 = vpop.permute.xlu0 %1636  ;;  %v2083_v6 = vsel %vm2076_vm10, %v2050_v7, %v1763_v43  ;;  %v780_v7 = vld [vmem:[#allocation2 + $0x139] sm:$0xff]  ;;  %v1930_v43 = vsel %vm1911_vm5, %v1897_v41, %v3631_v39 }
 0x137   : > { %1030 = vrot.lane.b32.xlu1 %v810_v21, %s3107_s18  ;;  %2925 = vmatprep.mubr.msk.f32.mxu0 %vm2121_vm11, %v2083_v6  ;;  %v305_v21 = vld [vmem:[%s3219_s17 + $0xe8] sm:$0xff]  ;;  %v2051_v33 = vsel %vm2043_vm9, %v2018_v2, %v1637_v10  ;;  %v801_v10 = vld [vmem:[#allocation2 + $0xb2] sm:$0xff]  ;;  %v1963_v1 = vsel %vm1944_vm6, %v1930_v43, %v3668_v58 }
 0x138   : > { %904 = vrot.lane.b32.xlu0 %v779_v20, %s3108_s19  ;;  %v387_v34 = vrot.slane %v305_v21, 7  ;;  %v1996_v63 = vsel %vm1977_vm7, %v1963_v1, %v3691_v26 }
 0x139   : > { %v3741_v3 = vpop.permute.xlu1 %1024  ;;  %v2029_v27 = vsel %vm2010_vm8, %v1996_v63, %v3722_v40  ;;  %v3832_v40 = vld [vmem:[#allocation2 + $0xe0] sm:$0xff] }
 0x13a   : > { %v3739_v45 = vpop.permute.xlu0 %874  ;;  %v388_v44 = vsel %vm341_vm0, %v386_v15, %v387_v34  ;;  %v474_v23 = vsel %vm341_vm0, %v387_v34, 0.0 }
 0x13b   : > { %1262 = vrot.lane.b32.xlu1 %v768_v35, %s3110_s21  ;;  %524 = vst.msk [vmem:[#allocation2 + $0x170] sm:$0xff] %vm476_vm1, %v388_v44 }
 0x13c   : > { %1136 = vrot.lane.b32.xlu0 %v3704_v62, %s3109_s20  ;;  %525 = vst.msk [vmem:[#allocation2 + $0x178] sm:$0x3] %vm479_vm2, %v474_v23  ;;  %v3876_v23 = vld [vmem:[#allocation2 + $0xc8] sm:$0xff] }
 0x13d   : > { %v3750_v47 = vpop.permute.xlu1 %1256 }
 0x13e   : > { %v3748_v28 = vpop.permute.xlu0 %1150 }
 0x13f   : > { %1538 = vrot.lane.b32.xlu1 %v3746_v13, %s3112_s23 }
 0x140   : > { %1412 = vrot.lane.b32.xlu0 %v811_v14, %s3111_s22 }
 0x141   : > { %v3764_v20 = vpop.permute.xlu1 %1532 }
 0x142   : > { %v3762_v9 = vpop.permute.xlu0 %1382 }
 0x143   : > { %1770 = vrot.lane.b32.xlu1 %v800_v53, %s3114_s14 }
 0x144   : > { %1644 = vrot.lane.b32.xlu0 %v769_v52, %s3113_s8 }
 0x145   : > { %v1765_v16 = vpop.permute.xlu1 %1764 }
 0x146   : > { %v1659_v24 = vpop.permute.xlu0 %1658  ;;  %v2084_v29 = vsel %vm2076_vm10, %v2051_v33, %v1765_v16  ;;  %v781_v33 = vld [vmem:[#allocation2 + $0x141] sm:$0xff] }
 0x147   : > { %1032 = vrot.lane.b32.xlu1 %v811_v14, %s3107_s18  ;;  %2926 = vmatmul.mubr.msk.f32.gmra.mxu0 %vm2121_vm11, %v2084_v29  ;;  %v2062_v39 = vsel %vm2043_vm9, %v2029_v27, %v1659_v24  ;;  %v812_v24 = vld [vmem:[#allocation2 + $0x13a] sm:$0xff]  ;;  %v1854_v27 = vsel %vm476_vm1, %v3377_v30, %v3622_v37 }
 0x148   : > { %882 = vrot.lane.b32.xlu0 %v768_v35, %s3108_s19  ;;  %v3790_v35 = vld [vmem:[#allocation2 + $0x140] sm:$0xff] }
 0x149   : > { %v3783_v32 = vpop.permute.xlu1 %1002 }
 0x14a   : > { %v3781_v59 = vpop.permute.xlu0 %876 }
 0x14b   : > { %1264 = vrot.lane.b32.xlu1 %v769_v52, %s3110_s21 }
 0x14c   : > { %1158 = vrot.lane.b32.xlu0 %v3746_v13, %s3109_s20 }
 0x14d   : > { %v3794_v42 = vpop.permute.xlu1 %1278 }
 0x14e   : > { %v3792_v14 = vpop.permute.xlu0 %1152 }
 0x14f   : > { %1540 = vrot.lane.b32.xlu1 %v3790_v35, %s3112_s23 }
 0x150   : > { %1390 = vrot.lane.b32.xlu0 %v800_v53, %s3111_s22 }
 0x151   : > { %v3808_v6 = vpop.permute.xlu1 %1510 }
 0x152   : > { %v3806_v15 = vpop.permute.xlu0 %1384 }
 0x153   : > { %1772 = vrot.lane.b32.xlu1 %v801_v10, %s3114_s14 }
 0x154   : > { %1666 = vrot.lane.b32.xlu0 %v780_v7, %s3113_s8 }
 0x155   : > { %v1787_v61 = vpop.permute.xlu1 %1786 }
 0x156   : > { %v1661_v54 = vpop.permute.xlu0 %1660  ;;  %v2095_v58 = vsel %vm2076_vm10, %v2062_v39, %v1787_v61  ;;  %v1887_v39 = vsel %vm1878_vm4, %v1854_v27, %v3662_v56  ;;  %v813_v61 = vld [vmem:[#allocation2 + $0x142] sm:$0xff] }
 0x157   : > { %1010 = vrot.lane.b32.xlu1 %v800_v53, %s3107_s18  ;;  %2943 = vmatprep.mubr.msk.f32.mxu1 %vm2121_vm11, %v2095_v58  ;;  %v1865_v53 = vsel %vm476_vm1, %v3832_v40, %v3592_v19  ;;  %v307_v58 = vld [vmem:[%s3219_s17 + $0xf8] sm:$0xff] }
 0x158   : > { %884 = vrot.lane.b32.xlu0 %v769_v52, %s3108_s19  ;;  %v1898_v21 = vsel %vm1878_vm4, %v1865_v53, %v3629_v38  ;;  %v1920_v53 = vsel %vm1911_vm5, %v1887_v39, %v3684_v18 }
 0x159   : > { %v3827_v22 = vpop.permute.xlu1 %1004  ;;  %v1931_v16 = vsel %vm1911_vm5, %v1898_v21, %v3664_v57  ;;  %v1953_v30 = vsel %vm1944_vm6, %v1920_v53, %v3708_v4 }
 0x15a   : > { %v3825_v26 = vpop.permute.xlu0 %898  ;;  %v1964_v19 = vsel %vm1944_vm6, %v1931_v16, %v3689_v25  ;;  %v306_v25 = vld [vmem:[%s3219_s17 + $0xf0] sm:$0xff]  ;;  %v1986_v37 = vsel %vm1977_vm7, %v1953_v30, %v3762_v9 }
 0x15b   : > { %1286 = vrot.lane.b32.xlu1 %v780_v7, %s3110_s21  ;;  %v1997_v44 = vsel %vm1977_vm7, %v1964_v19, %v3720_v31  ;;  %v389_v63 = vrot.slane %v306_v25, 7  ;;  %v390_v19 = vrot.slane %v307_v58, 7  ;;  %v2019_v18 = vsel %vm2010_vm8, %v1986_v37, %v3808_v6  ;;  %v3920_v6 = vld [vmem:[#allocation2 + $0x150] sm:$0xff]  ;;  %v3947_v58 = vld [vmem:[%s4668_s2] ss:$0 sm:$0xff] }
 0x15c   : > { %1160 = vrot.lane.b32.xlu0 %v3790_v35, %s3109_s20  ;;  %v2030_v38 = vsel %vm2010_vm8, %v1997_v44, %v3764_v20 }
 0x15d   : > { %v3838_v52 = vpop.permute.xlu1 %1280  ;;  %v2063_v50 = vsel %vm2043_vm9, %v2030_v38, %v1661_v54  ;;  %v458_v20 = vsel %vm341_vm0, 0.0, %v389_v63  ;;  %v770_v54 = vld [vmem:[#allocation2 + $0xc1] sm:$0xff]  ;;  %v391_v56 = vsel %vm341_vm0, %v389_v63, %v390_v19  ;;  %v771_v63 = vld [vmem:[#allocation2 + $0xc9] sm:$0xff] }
 0x15e   : > { %v3836_v2 = vpop.permute.xlu0 %1130  ;;  %526 = vst.msk [vmem:[#allocation2 + $0x180] sm:$0xff] %vm476_vm1, %v458_v20  ;;  %527 = vst.msk [vmem:[#allocation2 + $0x188] sm:$0xff] %vm476_vm1, %v391_v56  ;;  %v802_v20 = vld [vmem:[#allocation2 + $0xc2] sm:$0xff] }
 0x15f   : > { %1518 = vrot.lane.b32.xlu1 %v3834_v55, %s3112_s23 }
 0x160   : > { %1392 = vrot.lane.b32.xlu0 %v801_v10, %s3111_s22 }
 0x161   : > { %v3852_v29 = vpop.permute.xlu1 %1512 }
 0x162   : > { %v3850_v34 = vpop.permute.xlu0 %1406 }
 0x163   : > { %1794 = vrot.lane.b32.xlu1 %v812_v24, %s3114_s14 }
 0x164   : > { %1668 = vrot.lane.b32.xlu0 %v781_v33, %s3113_s8 }
 0x165   : > { %v1789_v41 = vpop.permute.xlu1 %1788 }
 0x166   : > { %v1639_v57 = vpop.permute.xlu0 %1638  ;;  %v2096_v43 = vsel %vm2076_vm10, %v2063_v50, %v1789_v41 }
 0x167   : > { %1012 = vrot.lane.b32.xlu1 %v801_v10, %s3107_s18  ;;  %2944 = vmatmul.mubr.msk.f32.vlgmr.msra.gmra.mxu1 %vm2121_vm11, %v2096_v43  ;;  %v2052_v44 = vsel %vm2043_vm9, %v2019_v18, %v1639_v57 }
 0x168   : > { %906 = vrot.lane.b32.xlu0 %v780_v7, %s3108_s19 }
 0x169   : > { %v3870_v1 = vpop.permute.xlu1 %1026 }
 0x16a   : > { %v3868_v31 = vpop.permute.xlu0 %900 }
 0x16b   : > { %1288 = vrot.lane.b32.xlu1 %v781_v33, %s3110_s21 }
 0x16c   : > { %1138 = vrot.lane.b32.xlu0 %v3834_v55, %s3109_s20 }
 0x16d   : > { %v3881_v10 = vpop.permute.xlu1 %1258 }
 0x16e   : > { %v3879_v7 = vpop.permute.xlu0 %1132 }
 0x16f   : > { %1520 = vrot.lane.b32.xlu1 %v3876_v23, %s3112_s23 }
 0x170   : > { %1414 = vrot.lane.b32.xlu0 %v812_v24, %s3111_s22 }
 0x171   : > { %v3896_v16 = vpop.permute.xlu1 %1534 }
 0x172   : > { %v3894_v21 = vpop.permute.xlu0 %1408 }
 0x173   : > { %1796 = vrot.lane.b32.xlu1 %v813_v61, %s3114_s14 }
 0x174   : > { %1646 = vrot.lane.b32.xlu0 %v770_v54, %s3113_s8 }
 0x175   : > { %v1767_v50 = vpop.permute.xlu1 %1766 }
 0x176   : > { %v1641_v38 = vpop.permute.xlu0 %1640  ;;  %v2085_v4 = vsel %vm2076_vm10, %v2052_v44, %v1767_v50 }
 0x177   : > { %1034 = vrot.lane.b32.xlu1 %v812_v24, %s3107_s18  ;;  %2928 = vmatprep.mubr.msk.f32.mxu0 %vm2121_vm11, %v2085_v4  ;;  %v475_v24 = vsel %vm341_vm0, %v390_v19, 0.0 }
 0x178   : > { %908 = vrot.lane.b32.xlu0 %v781_v33, %s3108_s19  ;;  %v1855_v33 = vsel %vm476_vm1, %v3388_v36, %v3656_v48  ;;  %528 = vst.msk [vmem:[#allocation2 + $0x190] sm:$0x3] %vm479_vm2, %v475_v24  ;;  %v1866_v24 = vsel %vm476_vm1, %v3407_v46, %v3674_v5 }
 0x179   : > { %v3915_v41 = vpop.permute.xlu1 %1028  ;;  %v1888_v25 = vsel %vm1878_vm4, %v1855_v33, %v3682_v12 }
 0x17a   : > { %v3913_v9 = vpop.permute.xlu0 %878  ;;  %v1921_v27 = vsel %vm1911_vm5, %v1888_v25, %v3706_v49  ;;  %v1899_v25 = vsel %vm1878_vm4, %v1866_v24, %v3699_v8 }
 0x17b   : > { %1266 = vrot.lane.b32.xlu1 %v770_v54, %s3110_s21  ;;  %v1954_v48 = vsel %vm1944_vm6, %v1921_v27, %v3750_v47  ;;  %v782_v27 = vld [vmem:[#allocation2 + $0x151] sm:$0xff] }
 0x17c   : > { %1140 = vrot.lane.b32.xlu0 %v3876_v23, %s3109_s20  ;;  %v1987_v12 = vsel %vm1977_vm7, %v1954_v48, %v3806_v15  ;;  %v803_v48 = vld [vmem:[#allocation2 + $0xca] sm:$0xff] }
 0x17d   : > { %v3924_v43 = vpop.permute.xlu1 %1260  ;;  %v2020_v49 = vsel %vm2010_vm8, %v1987_v12, %v3852_v29  ;;  %v1932_v12 = vsel %vm1911_vm5, %v1899_v25, %v3748_v28 }
 0x17e   : > { %v3922_v57 = vpop.permute.xlu0 %1154  ;;  %v2053_v19 = vsel %vm2043_vm9, %v2020_v49, %v1641_v38  ;;  %v1965_v46 = vsel %vm1944_vm6, %v1932_v12, %v3794_v42 }
 0x17f   : > { %1542 = vrot.lane.b32.xlu1 %v3920_v6, %s3112_s23  ;;  %v1998_v5 = vsel %vm1977_vm7, %v1965_v46, %v3850_v34 }
 0x180   : > { %1416 = vrot.lane.b32.xlu0 %v813_v61, %s3111_s22  ;;  %v2031_v8 = vsel %vm2010_vm8, %v1998_v5, %v3896_v16 }
 0x181   : > { %v3940_v36 = vpop.permute.xlu1 %1536 }
 0x182   : > { %v3938_v39 = vpop.permute.xlu0 %1386 }
 0x183   : > { %1774 = vrot.lane.b32.xlu1 %v802_v20, %s3114_s14  ;;  %v2918_v53 = vpop.f32.mrf.mxu0 }
 0x184   : > { %1648 = vrot.lane.b32.xlu0 %v771_v63, %s3113_s8  ;;  %v3957_v47 = vadd.f32 %v2918_v53, %v3947_v58 }
 0x185   : > { %v1769_v37 = vpop.permute.xlu1 %1768  ;;  %v2288_v56 = vpop.f32.mrf.mxu0 }
 0x186   : > { %v1663_v30 = vpop.permute.xlu0 %1662  ;;  %v2086_v18 = vsel %vm2076_vm10, %v2053_v19, %v1769_v37  ;;  %v3961_v15 = vadd.f32 %v3947_v58, %v2288_v56  ;;  %v2448_v29 = vsel %vm1878_vm4, %v3957_v47, 0.0 }
 0x187   : > { %1036 = vrot.lane.b32.xlu1 %v813_v61, %s3107_s18  ;;  %2929 = vmatmul.mubr.msk.f32.gmra.mxu0 %vm2121_vm11, %v2086_v18  ;;  %v2064_v19 = vsel %vm2043_vm9, %v2031_v8, %v1663_v30  ;;  %v783_v18 = vld [vmem:[#allocation2 + $0x159] sm:$0xff] }
 0x188   : > { %886 = vrot.lane.b32.xlu0 %v770_v54, %s3108_s19  ;;  %v2447_v44 = vsel %vm1878_vm4, %v3961_v15, 0.0  ;;  %v3977_v54 = vld [vmem:[#allocation2 + $0x158] sm:$0xff] }
 0x189   : > { %v3972_v50 = vpop.permute.xlu1 %1006  ;;  %v2449_v4 = vadd.f32 %v2448_v29, %v2447_v44  ;;  %v814_v29 = vld [vmem:[#allocation2 + $0x152] sm:$0xff] }
 0x18a   : > { %v3970_v38 = vpop.permute.xlu0 %880 }
 0x18b   : > { %1268 = vrot.lane.b32.xlu1 %v771_v63, %s3110_s21 }
 0x18c   : > { %1162 = vrot.lane.b32.xlu0 %v3920_v6, %s3109_s20 }
 0x18d   : > { %v3981_v33 = vpop.permute.xlu1 %1282 }
 0x18e   : > { %v3979_v61 = vpop.permute.xlu0 %1156 }
 0x18f   : > { %1544 = vrot.lane.b32.xlu1 %v3977_v54, %s3112_s23 }
 0x190   : > { %1394 = vrot.lane.b32.xlu0 %v802_v20, %s3111_s22 }
 0x191   : > { %v3995_v53 = vpop.permute.xlu1 %1514 }
 0x192   : > { %v3993_v49 = vpop.permute.xlu0 %1388 }
 0x193   : > { %1776 = vrot.lane.b32.xlu1 %v803_v48, %s3114_s14 }
 0x194   : > { %1670 = vrot.lane.b32.xlu0 %v782_v27, %s3113_s8 }
 0x195   : > { %v1791_v37 = vpop.permute.xlu1 %1790 }
 0x196   : > { %v1665_v28 = vpop.permute.xlu0 %1664  ;;  %v2097_v56 = vsel %vm2076_vm10, %v2064_v19, %v1791_v37 }
 0x197   : > { %1014 = vrot.lane.b32.xlu1 %v802_v20, %s3107_s18  ;;  %2946 = vmatprep.mubr.msk.f32.mxu1 %vm2121_vm11, %v2097_v56 }
 0x198   : > { %888 = vrot.lane.b32.xlu0 %v771_v63, %s3108_s19  ;;  %v1867_v63 = vsel %vm476_vm1, %v3426_v60, %v3697_v51 }
 0x199   : > { %v4012_v34 = vpop.permute.xlu1 %1008  ;;  %v1900_v20 = vsel %vm1878_vm4, %v1867_v63, %v3741_v3 }
 0x19a   : > { %v4010_v42 = vpop.permute.xlu0 %902  ;;  %v1933_v44 = vsel %vm1911_vm5, %v1900_v20, %v3792_v14 }
 0x19b   : > { %1290 = vrot.lane.b32.xlu1 %v782_v27, %s3110_s21  ;;  %v1966_v60 = vsel %vm1944_vm6, %v1933_v44, %v3838_v52  ;;  %v3035_v44 = vld [vmem:[#allocation2 + $0x78] sm:$0xff] }
 0x19c   : > { %1164 = vrot.lane.b32.xlu0 %v3977_v54, %s3109_s20  ;;  %v1999_v51 = vsel %vm1977_vm7, %v1966_v60, %v3894_v21  ;;  %v1856_v60 = vsel %vm476_vm1, %v3035_v44, %v3739_v45  ;;  %v804_v44 = vld [vmem:[#allocation2 + $0xda] sm:$0xff] }
 0x19d   : > { %v4019_v30 = vpop.permute.xlu1 %1284  ;;  %v2032_v3 = vsel %vm2010_vm8, %v1999_v51, %v3940_v36  ;;  %v815_v51 = vld [vmem:[#allocation2 + $0x15a] sm:$0xff] }
 0x19e   : > { %v4017_v16 = vpop.permute.xlu0 %1134  ;;  %v2065_v14 = vsel %vm2043_vm9, %v2032_v3, %v1665_v28 }
 0x19f   : > { %1522 = vrot.lane.b32.xlu1 %v3788_v17, %s3112_s23 }
 0x1a0   : > { %1396 = vrot.lane.b32.xlu0 %v803_v48, %s3111_s22 }
 0x1a1   : > { %v4033_v25 = vpop.permute.xlu1 %1516 }
 0x1a2   : > { %v4031_v24 = vpop.permute.xlu0 %1410 }
 0x1a3   : > { %1798 = vrot.lane.b32.xlu1 %v814_v29, %s3114_s14  ;;  %v2921_v12 = vpop.f32.mrf.mxu0 }
 0x1a4   : > { %1672 = vrot.lane.b32.xlu0 %v783_v18, %s3113_s8  ;;  %v4046_v52 = vadd.f32 %v2921_v12, %v3947_v58 }
 0x1a5   : > { %v1793_v5 = vpop.permute.xlu1 %1792  ;;  %v2298_v19 = vpop.f32.mrf.mxu0 }
 0x1a6   : > { %v1643_v46 = vpop.permute.xlu0 %1642  ;;  %v2098_v8 = vsel %vm2076_vm10, %v2065_v14, %v1793_v5  ;;  %v4049_v21 = vadd.f32 %v3947_v58, %v2298_v19  ;;  %v2452_v63 = vsel %vm1878_vm4, %v4046_v52, 0.0 }
 0x1a7   : > { %1016 = vrot.lane.b32.xlu1 %v803_v48, %s3107_s18  ;;  %2947 = vmatmul.mubr.msk.f32.gmra.mxu1 %vm2121_vm11, %v2098_v8 }
 0x1a8   : > { %910 = vrot.lane.b32.xlu0 %v782_v27, %s3108_s19  ;;  %v2450_v36 = vsel %vm1878_vm4, %v4049_v21, 0.0 }
 0x1a9   : > { %v4058_v37 = vpop.permute.xlu1 %1030  ;;  %v2451_v56 = vadd.f32 %v2450_v36, %v2449_v4  ;;  %v772_v4 = vld [vmem:[#allocation2 + $0xd9] sm:$0xff] }
 0x1aa   : > { %v4056_v28 = vpop.permute.xlu0 %904 }
 0x1ab   : > { %1292 = vrot.lane.b32.xlu1 %v783_v18, %s3110_s21  ;;  %v4065_v27 = vadd.f32 %v2452_v63, %v2451_v56  ;;  %v773_v63 = vld [vmem:[#allocation2 + $0xe1] sm:$0xff] }
 0x1ac   : > { %1142 = vrot.lane.b32.xlu0 %v3788_v17, %s3109_s20  ;;  %v1889_v17 = vsel %vm1878_vm4, %v1856_v60, %v3783_v32 }
 0x1ad   : > { %v4069_v20 = vpop.permute.xlu1 %1262  ;;  %v1922_v3 = vsel %vm1911_vm5, %v1889_v17, %v3836_v2 }
 0x1ae   : > { %v4067_v48 = vpop.permute.xlu0 %1136  ;;  %v1955_v45 = vsel %vm1944_vm6, %v1922_v3, %v3881_v10 }
 0x1af   : > { %1524 = vrot.lane.b32.xlu1 %v3832_v40, %s3112_s23  ;;  %v1988_v5 = vsel %vm1977_vm7, %v1955_v45, %v3938_v39 }
 0x1b0   : > { %1418 = vrot.lane.b32.xlu0 %v814_v29, %s3111_s22  ;;  %v2021_v32 = vsel %vm2010_vm8, %v1988_v5, %v3995_v53  ;;  %v4104_v53 = vld [vmem:[#allocation2 + $0x168] sm:$0xff] }
 0x1b1   : > { %v4082_v14 = vpop.permute.xlu1 %1538  ;;  %v2054_v8 = vsel %vm2043_vm9, %v2021_v32, %v1643_v46 }
 0x1b2   : > { %v4080_v12 = vpop.permute.xlu0 %1412 }
 0x1b3   : > { %1800 = vrot.lane.b32.xlu1 %v815_v51, %s3114_s14 }
 0x1b4   : > { %1650 = vrot.lane.b32.xlu0 %v772_v4, %s3113_s8 }
 0x1b5   : > { %v1771_v19 = vpop.permute.xlu1 %1770 }
 0x1b6   : > { %v1645_v2 = vpop.permute.xlu0 %1644  ;;  %v2087_v36 = vsel %vm2076_vm10, %v2054_v8, %v1771_v19  ;;  %v784_v8 = vld [vmem:[#allocation2 + $0x169] sm:$0xff] }
 0x1b7   : > { %1038 = vrot.lane.b32.xlu1 %v814_v29, %s3107_s18  ;;  %2931 = vmatprep.mubr.msk.f32.mxu0 %vm2121_vm11, %v2087_v36 }
 0x1b8   : > { %912 = vrot.lane.b32.xlu0 %v783_v18, %s3108_s19  ;;  %v3036_v18 = vld [vmem:[#allocation2 + $0x80] sm:$0xff] }
 0x1b9   : > { %v4099_v39 = vpop.permute.xlu1 %1032  ;;  %v1857_v29 = vsel %vm476_vm1, %v3036_v18, %v3781_v59 }
 0x1ba   : > { %v4097_v10 = vpop.permute.xlu0 %882 }
 0x1bb   : > { %1270 = vrot.lane.b32.xlu1 %v772_v4, %s3110_s21 }
 0x1bc   : > { %1144 = vrot.lane.b32.xlu0 %v3832_v40, %s3109_s20  ;;  %v1890_v40 = vsel %vm1878_vm4, %v1857_v29, %v3827_v22 }
 0x1bd   : > { %v4108_v56 = vpop.permute.xlu1 %1264  ;;  %v1923_v60 = vsel %vm1911_vm5, %v1890_v40, %v3879_v7  ;;  %v805_v40 = vld [vmem:[#allocation2 + $0xe2] sm:$0xff] }
 0x1be   : > { %v4106_v46 = vpop.permute.xlu0 %1158  ;;  %v1956_v59 = vsel %vm1944_vm6, %v1923_v60, %v3924_v43 }
 0x1bf   : > { %1546 = vrot.lane.b32.xlu1 %v4104_v53, %s3112_s23  ;;  %v1989_v3 = vsel %vm1977_vm7, %v1956_v59, %v3993_v49 }
 0x1c0   : > { %1420 = vrot.lane.b32.xlu0 %v815_v51, %s3111_s22  ;;  %v2022_v22 = vsel %vm2010_vm8, %v1989_v3, %v4033_v25  ;;  %v4143_v25 = vld [vmem:[#allocation2 + $0x170] sm:$0xff] }
 0x1c1   : > { %v4121_v4 = vpop.permute.xlu1 %1540  ;;  %v2055_v45 = vsel %vm2043_vm9, %v2022_v22, %v1645_v2 }
 0x1c2   : > { %v4119_v17 = vpop.permute.xlu0 %1390 }
 0x1c3   : > { %1778 = vrot.lane.b32.xlu1 %v804_v44, %s3114_s14 }
 0x1c4   : > { %1652 = vrot.lane.b32.xlu0 %v773_v63, %s3113_s8 }
 0x1c5   : > { %v1773_v5 = vpop.permute.xlu1 %1772 }
 0x1c6   : > { %v1667_v7 = vpop.permute.xlu0 %1666  ;;  %v2088_v32 = vsel %vm2076_vm10, %v2055_v45, %v1773_v5 }
 0x1c7   : > { %1166 = vrot.lane.b32.xlu1 %v4104_v53, %s3109_s20  ;;  %2932 = vmatmul.mubr.msk.f32.gmra.mxu0 %vm2121_vm11, %v2088_v32 }
 0x1c8   : > { %1040 = vrot.lane.b32.xlu0 %v815_v51, %s3107_s18  ;;  %v3037_v51 = vld [vmem:[#allocation2 + $0x108] sm:$0xff] }
 0x1c9   : > { %v4139_v49 = vpop.permute.xlu1 %1010  ;;  %v1868_v36 = vsel %vm476_vm1, %v3037_v51, %v3825_v26 }
 0x1ca   : > { %v4137_v43 = vpop.permute.xlu0 %884  ;;  %v1901_v18 = vsel %vm1878_vm4, %v1868_v36, %v3870_v1 }
 0x1cb   : > { %1398 = vrot.lane.b32.xlu1 %v804_v44, %s3111_s22 }
 0x1cc   : > { %1272 = vrot.lane.b32.xlu0 %v773_v63, %s3110_s21  ;;  %v1934_v63 = vsel %vm1911_vm5, %v1901_v18, %v3922_v57 }
 0x1cd   : > { %v4147_v19 = vpop.permute.xlu1 %1286  ;;  %v1967_v26 = vsel %vm1944_vm6, %v1934_v63, %v3981_v33 }
 0x1ce   : > { %v4145_v2 = vpop.permute.xlu0 %1160  ;;  %v2000_v3 = vsel %vm1977_vm7, %v1967_v26, %v4031_v24 }
 0x1cf   : > { %1674 = vrot.lane.b32.xlu1 %v784_v8, %s3113_s8  ;;  %v2033_v57 = vsel %vm2010_vm8, %v2000_v3, %v4082_v14  ;;  %v742_v14 = vld [vmem:[#allocation2 + $0xf0] sm:$0xff] }
 0x1d0   : > { %1548 = vrot.lane.b32.xlu0 %v4143_v25, %s3112_s23  ;;  %v2924_v29 = vpop.f32.mrf.mxu0  ;;  %v2066_v33 = vsel %vm2043_vm9, %v2033_v57, %v1667_v7  ;;  %v785_v7 = vld [vmem:[#allocation2 + $0x171] sm:$0xff] }
 0x1d1   : > { %v4160_v60 = vpop.permute.xlu1 %1518  ;;  %v4167_v22 = vadd.f32 %v2924_v29, %v3947_v58  ;;  %v3038_v3 = vld [vmem:[#allocation2 + $0x110] sm:$0xff] }
 0x1d2   : > { %v4158_v44 = vpop.permute.xlu0 %1392  ;;  %v2308_v59 = vpop.f32.mrf.mxu0 }
 0x1d3   : > { %v4170_v1 = vadd.f32 %v3947_v58, %v2308_v59  ;;  %1168 = vrot.lane.b32.xlu1 %v4143_v25, %s3109_s20  ;;  %v2456_v36 = vsel %vm1878_vm4, %v4167_v22, 0.0 }
 0x1d4   : > { %1780 = vrot.lane.b32.xlu0 %v805_v40, %s3114_s14 }
 0x1d5   : > { %v2454_v45 = vsel %vm1878_vm4, %v4170_v1, 0.0  ;;  %v1795_v5 = vpop.permute.xlu1 %1794 }
 0x1d6   : > { %v1669_v24 = vpop.permute.xlu0 %1668  ;;  %v2455_v32 = vadd.f32 %v2454_v45, %v4065_v27  ;;  %v2099_v51 = vsel %vm2076_vm10, %v2066_v33, %v1795_v5  ;;  %v816_v27 = vld [vmem:[#allocation2 + $0x16a] sm:$0xff] }
 0x1d7   : > { %1400 = vrot.lane.b32.xlu1 %v805_v40, %s3111_s22  ;;  %2949 = vmatprep.mubr.msk.f32.mxu1 %vm2121_vm11, %v2099_v51  ;;  %v1869_v40 = vsel %vm476_vm1, %v3038_v3, %v3868_v31  ;;  %v774_v51 = vld [vmem:[#allocation2 + $0xf1] sm:$0xff] }
 0x1d8   : > { %1294 = vrot.lane.b32.xlu0 %v784_v8, %s3110_s21  ;;  %v4187_v18 = vadd.f32 %v2456_v36, %v2455_v32  ;;  %v1902_v57 = vsel %vm1878_vm4, %v1869_v40, %v3915_v41 }
 0x1d9   : > { %v1013_v63 = vpop.permute.xlu1 %1012  ;;  %v1935_v33 = vsel %vm1911_vm5, %v1902_v57, %v3979_v61 }
 0x1da   : > { %v907_v29 = vpop.permute.xlu0 %906  ;;  %v1968_v32 = vsel %vm1944_vm6, %v1935_v33, %v4019_v30  ;;  %v817_v30 = vld [vmem:[#allocation2 + $0x172] sm:$0xff]  ;;  %v1861_v33 = vsel %vm476_vm1, %v3704_v62, %v4137_v43  ;;  %v754_v43 = vld [vmem:[#allocation2 + $0x180] sm:$0xff] }
 0x1db   : > { %1676 = vrot.lane.b32.xlu1 %v785_v7, %s3113_s8  ;;  %v2001_v31 = vsel %vm1977_vm7, %v1968_v32, %v4080_v12  ;;  %v1872_v12 = vsel %vm476_vm1, %v3746_v13, %v907_v29  ;;  %v1894_v13 = vsel %vm1878_vm4, %v1861_v33, %v1013_v63  ;;  %v807_v33 = vld [vmem:[#allocation2 + $0xfa] sm:$0xff] }
 0x1dc   : > { %1526 = vrot.lane.b32.xlu0 %v742_v14, %s3112_s23  ;;  %v2034_v41 = vsel %vm2010_vm8, %v2001_v31, %v4121_v4 }
 0x1dd   : > { %v4191_v59 = vpop.permute.xlu1 %1288  ;;  %v2067_v61 = vsel %vm2043_vm9, %v2034_v41, %v1669_v24  ;;  %v1860_v24 = vsel %vm476_vm1, %v3679_v11, %v4097_v10  ;;  %v3039_v10 = vld [vmem:[#allocation2 + $0x90] sm:$0xff] }
 0x1de   : > { %v1139_v26 = vpop.permute.xlu0 %1138  ;;  %v1893_v32 = vsel %vm1878_vm4, %v1860_v24, %v4139_v49  ;;  %v775_v49 = vld [vmem:[#allocation2 + $0xf9] sm:$0xff] }
 0x1df   : > { %914 = vrot.lane.b32.xlu1 %v784_v8, %s3108_s19  ;;  %v743_v8 = vld [vmem:[#allocation2 + $0xf8] sm:$0xff]  ;;  %v1926_v29 = vsel %vm1911_vm5, %v1893_v32, %v1139_v26 }
 0x1e0   : > { %1802 = vrot.lane.b32.xlu0 %v816_v27, %s3114_s14 }
 0x1e1   : > { %v4203_v5 = vpop.permute.xlu1 %1520 }
 0x1e2   : > { %v4201_v45 = vpop.permute.xlu0 %1414 }
 0x1e3   : > { %1422 = vrot.lane.b32.xlu1 %v816_v27, %s3111_s22 }
 0x1e4   : > { %1296 = vrot.lane.b32.xlu0 %v785_v7, %s3110_s21 }
 0x1e5   : > { %v1797_v14 = vpop.permute.xlu1 %1796 }
 0x1e6   : > { %v1647_v36 = vpop.permute.xlu0 %1646  ;;  %v2100_v3 = vsel %vm2076_vm10, %v2067_v61, %v1797_v14 }
 0x1e7   : > { %1654 = vrot.lane.b32.xlu1 %v774_v51, %s3113_s8  ;;  %2950 = vmatmul.mubr.msk.f32.gmra.mxu1 %vm2121_vm11, %v2100_v3 }
 0x1e8   : > { %1528 = vrot.lane.b32.xlu0 %v743_v8, %s3112_s23 }
 0x1e9   : > { %v1035_v4 = vpop.permute.xlu1 %1034 }
 0x1ea   : > { %v909_v40 = vpop.permute.xlu0 %908  ;;  %v1905_v57 = vsel %vm1878_vm4, %v1872_v12, %v1035_v4 }
 0x1eb   : > { %916 = vrot.lane.b32.xlu1 %v785_v7, %s3108_s19  ;;  %v1858_v7 = vsel %vm476_vm1, %v3039_v10, %v3913_v9  ;;  %s270_s19 = scalar_lea.vmem [#allocation3], %s269_s13 }
 0x1ec   : > { %1804 = vrot.lane.b32.xlu0 %v817_v30, %s3114_s14  ;;  %v1891_v62 = vsel %vm1878_vm4, %v1858_v7, %v3972_v50  ;;  %v787_v7 = vld [vmem:[#allocation2 + $0x189] sm:$0xff] }
 0x1ed   : > { %v1267_v41 = vpop.permute.xlu1 %1266  ;;  %v1924_v63 = vsel %vm1911_vm5, %v1891_v62, %v4017_v16  ;;  %v818_v62 = vld [vmem:[#allocation2 + $0x182] sm:$0xff] }
 0x1ee   : > { %v1141_v31 = vpop.permute.xlu0 %1140  ;;  %v4235_v11 = vsel %vm1944_vm6, %v1926_v29, %v1267_v41  ;;  %v1957_v61 = vsel %vm1944_vm6, %v1924_v63, %v4069_v20  ;;  %v755_v20 = vld [vmem:[#allocation2 + $0x188] sm:$0xff] }
 0x1ef   : > { %v1927_v8 = vsel %vm1911_vm5, %v1894_v13, %v1141_v31  ;;  %1424 = vrot.lane.b32.xlu1 %v817_v30, %s3111_s22  ;;  %v1990_v9 = vsel %vm1977_vm7, %v1957_v61, %v4119_v17  ;;  %v1873_v17 = vsel %vm476_vm1, %v3790_v35, %v909_v40  ;;  %v3040_v31 = vld [vmem:[#allocation2 + $0x98] sm:$0xff] }
 0x1f0   : > { %1042 = vrot.lane.b32.xlu0 %v816_v27, %s3107_s18  ;;  %v2023_v50 = vsel %vm2010_vm8, %v1990_v9, %v4160_v60  ;;  %v806_v27 = vld [vmem:[#allocation2 + $0xf2] sm:$0xff]  ;;  %v1859_v35 = vsel %vm476_vm1, %v3040_v31, %v3970_v38 }
 0x1f1   : > { %v4247_v51 = vpop.permute.xlu1 %1542  ;;  %v2056_v16 = vsel %vm2043_vm9, %v2023_v50, %v1647_v36  ;;  %v786_v36 = vld [vmem:[#allocation2 + $0x181] sm:$0xff]  ;;  %v1892_v40 = vsel %vm1878_vm4, %v1859_v35, %v4012_v34 }
 0x1f2   : > { %v4245_v26 = vpop.permute.xlu0 %1416  ;;  %v1925_v41 = vsel %vm1911_vm5, %v1892_v40, %v4067_v48 }
 0x1f3   : > { %1656 = vrot.lane.b32.xlu1 %v775_v49, %s3113_s8 }
 0x1f4   : > { %1550 = vrot.lane.b32.xlu0 %v754_v43, %s3112_s23 }
 0x1f5   : > { %v1775_v3 = vpop.permute.xlu1 %1774 }
 0x1f6   : > { %v1649_v14 = vpop.permute.xlu0 %1648  ;;  %v2089_v12 = vsel %vm2076_vm10, %v2056_v16, %v1775_v3 }
 0x1f7   : > { %1044 = vrot.lane.b32.xlu1 %v817_v30, %s3107_s18  ;;  %2934 = vmatprep.mubr.msk.f32.mxu0 %vm2121_vm11, %v2089_v12 }
 0x1f8   : > { %1782 = vrot.lane.b32.xlu0 %v806_v27, %s3114_s14 }
 0x1f9   : > { %v1037_v24 = vpop.permute.xlu1 %1036 }
 0x1fa   : > { %v887_v4 = vpop.permute.xlu0 %886  ;;  %v1906_v60 = vsel %vm1878_vm4, %v1873_v17, %v1037_v24  ;;  %v3041_v24 = vld [vmem:[#allocation2 + $0x120] sm:$0xff] }
 0x1fb   : > { %1552 = vrot.lane.b32.xlu1 %v755_v20, %s3112_s23 }
 0x1fc   : > { %1170 = vrot.lane.b32.xlu0 %v754_v43, %s3109_s20 }
 0x1fd   : > { %v1269_v13 = vpop.permute.xlu1 %1268 }
 0x1fe   : > { %v1163_v32 = vpop.permute.xlu0 %1162  ;;  %v4269_v29 = vsel %vm1944_vm6, %v1927_v8, %v1269_v13  ;;  %v1958_v8 = vsel %vm1944_vm6, %v1925_v41, %v4108_v56  ;;  %v788_v41 = vld [vmem:[#allocation2 + $0x199] sm:$0xff] }
 0x1ff   : > { %v1938_v30 = vsel %vm1911_vm5, %v1905_v57, %v1163_v32  ;;  %1784 = vrot.lane.b32.xlu1 %v807_v33, %s3114_s14  ;;  %v1991_v38 = vsel %vm1977_vm7, %v1958_v8, %v4158_v44  ;;  %v1862_v44 = vsel %vm476_vm1, %v3834_v55, %v887_v4  ;;  %v756_v32 = vld [vmem:[#allocation2 + $0x198] sm:$0xff]  ;;  %v789_v8 = vld [vmem:[#allocation2 + $0x1a1] sm:$0xff] }
 0x200   : > { %1678 = vrot.lane.b32.xlu0 %v786_v36, %s3113_s8  ;;  %v2024_v34 = vsel %vm2010_vm8, %v1991_v38, %v4203_v5 }
 0x201   : > { %v4281_v57 = vpop.permute.xlu1 %1544  ;;  %v2057_v48 = vsel %vm2043_vm9, %v2024_v34, %v1649_v14  ;;  %v819_v14 = vld [vmem:[#allocation2 + $0x18a] sm:$0xff] }
 0x202   : > { %v4279_v10 = vpop.permute.xlu0 %1394 }
 0x203   : > { %1298 = vrot.lane.b32.xlu1 %v786_v36, %s3110_s21  ;;  %v1870_v36 = vsel %vm476_vm1, %v3041_v24, %v4010_v42 }
 0x204   : > { %1172 = vrot.lane.b32.xlu0 %v755_v20, %s3109_s20  ;;  %s2762_s20 = sshll.u32 %s270_s19, 4  ;;  %s2763_s20 = int_to_ptr.vmem [resolvable:$true] %s2762_s20 }
 0x205   : > { %v1777_v49 = vpop.permute.xlu1 %1776  ;;  %s3044_s29 = scalar_lea.vmem %s2763_s20, 16 }
 0x206   : > { %v1671_v43 = vpop.permute.xlu0 %1670  ;;  %v2090_v63 = vsel %vm2076_vm10, %v2057_v48, %v1777_v49  ;;  %p3045_p11 = scmp.ne.s32.totalorder %s2763_s20, %s3044_s29 }
 0x207   : > { %1806 = vrot.lane.b32.xlu1 %v818_v62, %s3114_s14  ;;  %v2927_v56 = vpop.f32.mrf.mxu0  ;;  %2935 = vmatmul.mubr.msk.f32.gmra.mxu0 %vm2121_vm11, %v2090_v63 }
 0x208   : > { %1680 = vrot.lane.b32.xlu0 %v787_v7, %s3113_s8  ;;  %v4300_v27 = vadd.f32 %v2927_v56, %v3947_v58  ;;  %p3046_p12 = pnand %p3045_p11, %p3195_p5 }
 0x209   : > { %v1015_v5 = vpop.permute.xlu1 %1014  ;;  %v2318_v50 = vpop.f32.mrf.mxu0 }
 0x20a   : > { %v889_v61 = vpop.permute.xlu0 %888  ;;  %v1895_v9 = vsel %vm1878_vm4, %v1862_v44, %v1015_v5  ;;  %v4303_v16 = vadd.f32 %v3947_v58, %v2318_v50  ;;  %v2460_v33 = vsel %vm1878_vm4, %v4300_v27, 0.0  ;;  %v3042_v44 = vld [vmem:[#allocation2 + $0x128] sm:$0xff]  ;;  %p3047_p13 = pneg %p3046_p12 }
 0x20b   : > { %1426 = vrot.lane.b32.xlu1 %v818_v62, %s3111_s22  ;;  %v1863_v62 = vsel %vm476_vm1, %v3876_v23, %v889_v61  ;;  %v1871_v5 = vsel %vm476_vm1, %v3042_v44, %v4056_v28 }
 0x20c   : > { %1300 = vrot.lane.b32.xlu0 %v787_v7, %s3110_s21  ;;  %v2458_v3 = vsel %vm1878_vm4, %v4303_v16, 0.0  ;;  %v1904_v23 = vsel %vm1878_vm4, %v1871_v5, %v4099_v39 }
 0x20d   : > { %v1291_v12 = vpop.permute.xlu1 %1290  ;;  %v2459_v20 = vadd.f32 %v2458_v3, %v4187_v18  ;;  %v1903_v18 = vsel %vm1878_vm4, %v1870_v36, %v4058_v37  ;;  %v1937_v61 = vsel %vm1911_vm5, %v1904_v23, %v4145_v2 }
 0x20e   : > { %v1165_v55 = vpop.permute.xlu0 %1164  ;;  %v4314_v4 = vsel %vm1944_vm6, %v1938_v30, %v1291_v12  ;;  %v1936_v30 = vsel %vm1911_vm5, %v1903_v18, %v4106_v46  ;;  %v1970_v3 = vsel %vm1944_vm6, %v1937_v61, %v4191_v59 }
 0x20f   : > { %v4311_v17 = vsel %vm1911_vm5, %v1906_v60, %v1165_v55  ;;  %1428 = vrot.lane.b32.xlu1 %v819_v14, %s3111_s22  ;;  %v757_v60 = vld [vmem:[#allocation2 + $0x1a0] sm:$0xff]  ;;  %v4324_v13 = vadd.f32 %v2460_v33, %v2459_v20  ;;  %v1969_v35 = vsel %vm1944_vm6, %v1936_v30, %v4147_v19  ;;  %v2003_v55 = vsel %vm1977_vm7, %v1970_v3, %v4245_v26 }
 0x210   : > { %1808 = vrot.lane.b32.xlu0 %v819_v14, %s3114_s14  ;;  %v2002_v40 = vsel %vm1977_vm7, %v1969_v35, %v4201_v45  ;;  %v820_v19 = vld [vmem:[#allocation2 + $0x19a] sm:$0xff]  ;;  %v821_v45 = vld [vmem:[#allocation2 + $0x1a2] sm:$0xff] }
 0x211   : > { %v1523_v42 = vpop.permute.xlu1 %1522  ;;  %v2035_v37 = vsel %vm2010_vm8, %v2002_v40, %v4247_v51 }
 0x212   : > { %v4328_v31 = vpop.permute.xlu0 %1396  ;;  %v2068_v46 = vsel %vm2043_vm9, %v2035_v37, %v1671_v43 }
 0x213   : > { %1556 = vrot.lane.b32.xlu1 %v757_v60, %s3112_s23 }
 0x214   : > { %1554 = vrot.lane.b32.xlu0 %v756_v32, %s3112_s23  ;;  %v1992_v32 = vsel %vm1977_vm7, %v4235_v11, %v4279_v10  ;;  %s4631_s23 = scalar_lea.hbm %s4673_s7, %s2860_s15 }
 0x215   : > { %v1799_v34 = vpop.permute.xlu1 %1798  ;;  %v2025_v60 = vsel %vm2010_vm8, %v1992_v32, %v1523_v42 }
 0x216   : > { %v1673_v38 = vpop.permute.xlu0 %1672  ;;  %v2101_v7 = vsel %vm2076_vm10, %v2068_v46, %v1799_v34  ;;  %v1993_v34 = vsel %vm1977_vm7, %v4269_v29, %v4328_v31 }
 0x217   : > { %1684 = vrot.lane.b32.xlu1 %v789_v8, %s3113_s8  ;;  %2952 = vmatprep.mubr.msk.f32.mxu1 %vm2121_vm11, %v2101_v7 }
 0x218   : > { %1682 = vrot.lane.b32.xlu0 %v788_v41, %s3113_s8  ;;  %s3048_s8 = sshll.u32 %s3116_s28, 4  ;;  %s3049_s8 = int_to_ptr.vmem [resolvable:$false] %s3048_s8 }
 0x219   : > { %v1017_v48 = vpop.permute.xlu1 %1016  ;;  %p3051_p0 = scmp.lt.s32.totalorder %s2763_s20, %s3049_s8 }
 0x21a   : > { %v911_v51 = vpop.permute.xlu0 %910  ;;  %v4346_v49 = vsel %vm1878_vm4, %v1863_v62, %v1017_v48 }
 0x21b   : > { %1812 = vrot.lane.b32.xlu1 %v821_v45, %s3114_s14  ;;  %v1874_v2 = vsel %vm476_vm1, %v3920_v6, %v911_v51 }
 0x21c   : > { %1810 = vrot.lane.b32.xlu0 %v820_v19, %s3114_s14 }
 0x21d   : > { %v4350_v63 = vpop.permute.xlu1 %1292 }
 0x21e   : > { %v1143_v43 = vpop.permute.xlu0 %1142 }
 0x21f   : > { %v4353_v56 = vsel %vm1911_vm5, %v1895_v9, %v1143_v43  ;;  %v2036_v9 = vsel %vm2010_vm8, %v2003_v55, %v4281_v57 }
 0x220   : > { %v2069_v12 = vsel %vm2043_vm9, %v2036_v9, %v1673_v38 }
 0x221   : > { %v1525_v14 = vpop.permute.xlu1 %1524 }
 0x222   : > { %v1419_v50 = vpop.permute.xlu0 %1418  ;;  %v2026_v7 = vsel %vm2010_vm8, %v1993_v34, %v1525_v14 }
 0x223   : > { %v2004_v3 = vsel %vm1977_vm7, %v4314_v4, %v1419_v50  ;;  %v1972_v50 = vsel %vm1944_vm6, %v4311_v17, %v4350_v63 }
 0x225   : > { %v1801_v20 = vpop.permute.xlu1 %1800 }
 0x226   : > { %v1651_v28 = vpop.permute.xlu0 %1650  ;;  %v2102_v39 = vsel %vm2076_vm10, %v2069_v12, %v1801_v20 }
 0x227   : > { %2953 = vmatmul.mubr.msk.f32.gmra.mxu1 %vm2121_vm11, %v2102_v39  ;;  %v2058_v30 = vsel %vm2043_vm9, %v2025_v60, %v1651_v28 }
 0x229   : > { %v1039_v36 = vpop.permute.xlu1 %1038 }
 0x22a   : > { %v913_v24 = vpop.permute.xlu0 %912  ;;  %v4373_v59 = vsel %vm1878_vm4, %v1874_v2, %v1039_v36 }
 0x22b   : > { %v1875_v37 = vsel %vm476_vm1, %v3977_v54, %v913_v24 }
 0x22d   : > { %v1271_v33 = vpop.permute.xlu1 %1270 }
 0x22e   : > { %v4375_v26 = vpop.permute.xlu0 %1144  ;;  %v1961_v34 = vsel %vm1944_vm6, %v4353_v56, %v1271_v33 }
 0x231   : > { %v1547_v18 = vpop.permute.xlu1 %1546 }
 0x232   : > { %v1421_v57 = vpop.permute.xlu0 %1420  ;;  %v2037_v9 = vsel %vm2010_vm8, %v2004_v3, %v1547_v18 }
 0x233   : > { %v2005_v18 = vsel %vm1977_vm7, %v1972_v50, %v1421_v57 }
 0x235   : > { %v1779_v6 = vpop.permute.xlu1 %1778 }
 0x236   : > { %v1653_v35 = vpop.permute.xlu0 %1652  ;;  %v2091_v40 = vsel %vm2076_vm10, %v2058_v30, %v1779_v6 }
 0x237   : > { %2937 = vmatprep.mubr.msk.f32.mxu0 %vm2121_vm11, %v2091_v40  ;;  %v2059_v19 = vsel %vm2043_vm9, %v2026_v7, %v1653_v35 }
 0x239   : > { %v4386_v8 = vpop.permute.xlu1 %1166 }
 0x23a   : > { %v1041_v41 = vpop.permute.xlu0 %1040 }
 0x23b   : > { %v4389_v46 = vsel %vm1878_vm4, %v1875_v37, %v1041_v41 }
 0x23d   : > { %v1399_v10 = vpop.permute.xlu1 %1398 }
 0x23e   : > { %v1273_v11 = vpop.permute.xlu0 %1272  ;;  %v1994_v17 = vsel %vm1977_vm7, %v1961_v34, %v1399_v10 }
 0x241   : > { %v1675_v38 = vpop.permute.xlu1 %1674 }
 0x242   : > { %v1549_v42 = vpop.permute.xlu0 %1548  ;;  %v2070_v28 = vsel %vm2043_vm9, %v2037_v9, %v1675_v38 }
 0x243   : > { %v2038_v32 = vsel %vm2010_vm8, %v2005_v18, %v1549_v42 }
 0x245   : > { %v4396_v54 = vpop.permute.xlu1 %1168 }
 0x246   : > { %v1781_v45 = vpop.permute.xlu0 %1780 }
 0x247   : > { %v2092_v62 = vsel %vm2076_vm10, %v2059_v19, %v1781_v45  ;;  %v2930_v51 = vpop.f32.mrf.mxu0  ;;  %v1929_v45 = vsel %vm1911_vm5, %v4346_v49, %v4375_v26  ;;  %v1940_v49 = vsel %vm1911_vm5, %v4373_v59, %v4386_v8  ;;  %v1941_v59 = vsel %vm1911_vm5, %v4389_v46, %v4396_v54 }
 0x248   : > { %2938 = vmatmul.mubr.msk.f32.gmra.mxu0 %vm2121_vm11, %v2092_v62  ;;  %v4401_v5 = vadd.f32 %v2930_v51, %v3947_v58  ;;  %v1962_v56 = vsel %vm1944_vm6, %v1929_v45, %v1273_v11 }
 0x249   : > { %v1401_v43 = vpop.permute.xlu1 %1400  ;;  %v2328_v44 = vpop.f32.mrf.mxu0 }
 0x24a   : > { %v1295_v48 = vpop.permute.xlu0 %1294  ;;  %v4404_v29 = vadd.f32 %v3947_v58, %v2328_v44  ;;  %v2464_v55 = vsel %vm1878_vm4, %v4401_v5, 0.0  ;;  %v1995_v33 = vsel %vm1977_vm7, %v1962_v56, %v1401_v43 }
 0x24b   : > { %v1973_v11 = vsel %vm1944_vm6, %v1940_v49, %v1295_v48 }
 0x24c   : > { %v2462_v31 = vsel %vm1878_vm4, %v4404_v29, 0.0 }
 0x24d   : > { %v1677_v61 = vpop.permute.xlu1 %1676  ;;  %v2463_v14 = vadd.f32 %v2462_v31, %v4324_v13 }
 0x24e   : > { %v1527_v23 = vpop.permute.xlu0 %1526  ;;  %v2071_v60 = vsel %vm2043_vm9, %v2038_v32, %v1677_v61 }
 0x24f   : > { %v4414_v12 = vadd.f32 %v2464_v55, %v2463_v14  ;;  %v2027_v63 = vsel %vm2010_vm8, %v1994_v17, %v1527_v23 }
 0x251   : > { %v4417_v39 = vpop.permute.xlu1 %914 }
 0x252   : > { %v1803_v20 = vpop.permute.xlu0 %1802  ;;  %v1876_v46 = vsel %vm476_vm1, %v4104_v53, %v4417_v39 }
 0x253   : > { %v2103_v2 = vsel %vm2076_vm10, %v2070_v28, %v1803_v20 }
 0x254   : > { %2955 = vmatprep.mubr.msk.f32.mxu1 %vm2121_vm11, %v2103_v2 }
 0x255   : > { %v1423_v24 = vpop.permute.xlu1 %1422 }
 0x256   : > { %v1297_v13 = vpop.permute.xlu0 %1296  ;;  %v2006_v43 = vsel %vm1977_vm7, %v1973_v11, %v1423_v24 }
 0x257   : > { %v1974_v48 = vsel %vm1944_vm6, %v1941_v59, %v1297_v13  ;;  %v2521_v59 = vsel %vm1878_vm4, %v4046_v52, -inf }
 0x259   : > { %v1655_v4 = vpop.permute.xlu1 %1654 }
 0x25a   : > { %v1529_v36 = vpop.permute.xlu0 %1528  ;;  %v2060_v57 = vsel %vm2043_vm9, %v2027_v63, %v1655_v4 }
 0x25b   : > { %v2028_v10 = vsel %vm2010_vm8, %v1995_v33, %v1529_v36 }
 0x25d   : > { %v917_v35 = vpop.permute.xlu1 %916 }
 0x25e   : > { %v1805_v30 = vpop.permute.xlu0 %1804  ;;  %v1877_v54 = vsel %vm476_vm1, %v4143_v25, %v917_v35 }
 0x25f   : > { %v2104_v6 = vsel %vm2076_vm10, %v2071_v60, %v1805_v30 }
 0x260   : > { %2956 = vmatmul.mubr.msk.f32.gmra.mxu1 %vm2121_vm11, %v2104_v6 }
 0x261   : > { %v1425_v37 = vpop.permute.xlu1 %1424 }
 0x262   : > { %v1043_v40 = vpop.permute.xlu0 %1042  ;;  %v2007_v24 = vsel %vm1977_vm7, %v1974_v48, %v1425_v37  ;;  %v2520_v48 = vsel %vm1878_vm4, %v4049_v21, -inf }
 0x263   : > { %v1909_v13 = vsel %vm1878_vm4, %v1876_v46, %v1043_v40 }
 0x265   : > { %v1657_v38 = vpop.permute.xlu1 %1656 }
 0x266   : > { %v1551_v41 = vpop.permute.xlu0 %1550  ;;  %v2061_v44 = vsel %vm2043_vm9, %v2028_v10, %v1657_v38 }
 0x267   : > { %v2039_v3 = vsel %vm2010_vm8, %v2006_v43, %v1551_v41 }
 0x269   : > { %v1045_v7 = vpop.permute.xlu1 %1044 }
 0x26a   : > { %v1783_v42 = vpop.permute.xlu0 %1782  ;;  %v1910_v6 = vsel %vm1878_vm4, %v1877_v54, %v1045_v7  ;;  %v2526_v54 = vsel %vm1878_vm4, %v4303_v16, -inf  ;;  %v2532_v16 = vsel %vm1878_vm4, %v4401_v5, -inf }
 0x26b   : > { %v2093_v19 = vsel %vm2076_vm10, %v2060_v57, %v1783_v42 }
 0x26c   : > { %2940 = vmatprep.mubr.msk.f32.mxu0 %vm2121_vm11, %v2093_v19 }
 0x26d   : > { %v1553_v51 = vpop.permute.xlu1 %1552 }
 0x26e   : > { %v1171_v62 = vpop.permute.xlu0 %1170  ;;  %v2040_v36 = vsel %vm2010_vm8, %v2007_v24, %v1553_v51  ;;  %v2524_v24 = vsel %vm1878_vm4, %v4167_v22, -inf }
 0x26f   : > { %v1942_v41 = vsel %vm1911_vm5, %v1909_v13, %v1171_v62 }
 0x271   : > { %v1785_v23 = vpop.permute.xlu1 %1784 }
 0x272   : > { %v1679_v31 = vpop.permute.xlu0 %1678  ;;  %v2094_v61 = vsel %vm2076_vm10, %v2061_v44, %v1785_v23 }
 0x273   : > { %2941 = vmatmul.mubr.msk.f32.gmra.mxu0 %vm2121_vm11, %v2094_v61  ;;  %v2072_v55 = vsel %vm2043_vm9, %v2039_v3, %v1679_v31 }
 0x275   : > { %v1299_v14 = vpop.permute.xlu1 %1298 }
 0x276   : > { %v1173_v26 = vpop.permute.xlu0 %1172  ;;  %v1975_v63 = vsel %vm1944_vm6, %v1942_v41, %v1299_v14 }
 0x277   : > { %v1943_v38 = vsel %vm1911_vm5, %v1910_v6, %v1173_v26 }
 0x279   : > { %v1807_v28 = vpop.permute.xlu1 %1806 }
 0x27a   : > { %v1681_v9 = vpop.permute.xlu0 %1680  ;;  %v2105_v20 = vsel %vm2076_vm10, %v2072_v55, %v1807_v28  ;;  %v2593_v55 = vld [vmem:[%s4669_s3 + $0x8] sm:$0xff]  ;;  %v2518_v28 = vsel %vm1878_vm4, %v3961_v15, -inf }
 0x27b   : > { %2958 = vmatprep.mubr.msk.f32.mxu1 %vm2121_vm11, %v2105_v20  ;;  %v2073_v4 = vsel %vm2043_vm9, %v2040_v36, %v1681_v9  ;;  %v2592_v9 = vld [vmem:[%s4669_s3] sm:$0xff]  ;;  %2965 = vmatpush3.msra.mxu1 %v2593_v55  ;;  %v2519_v20 = vsel %vm1878_vm4, %v3957_v47, -inf  ;;  %v2528_v47 = vsel %vm1878_vm4, %v4300_v27, -inf }
 0x27c   : > { %2966 = vmatprep.subr.mxu1 %v3106_v0 }
 0x27d   : > { %v1427_v2 = vpop.permute.xlu1 %1426  ;;  %2967 = vmatpush3.msra.mxu1 %v2592_v9 }
 0x27e   : > { %v1301_v8 = vpop.permute.xlu0 %1300  ;;  %v2008_v53 = vsel %vm1977_vm7, %v1975_v63, %v1427_v2  ;;  %2971 = vmatprep.subr.mxu1 %v3106_v0 }
 0x27f   : > { %v1976_v57 = vsel %vm1944_vm6, %v1943_v38, %v1301_v8  ;;  %v2525_v8 = vmax.f32 %v2519_v20, %v2518_v28 }
 0x281   : > { %v1429_v18 = vpop.permute.xlu1 %1428  ;;  %v2523_v2 = vmax.f32 %v2521_v59, %v2525_v8 }
 0x282   : > { %v1809_v50 = vpop.permute.xlu0 %1808  ;;  %v2009_v25 = vsel %vm1977_vm7, %v1976_v57, %v1429_v18  ;;  %v2945_v18 = vpop.f32.mrf.mxu1 }
 0x283   : > { %v2106_v32 = vsel %vm2076_vm10, %v2073_v4, %v1809_v50  ;;  %v2529_v36 = vmax.f32 %v2520_v48, %v2523_v2  ;;  %v2522_v50 = vsel %vm1878_vm4, %v4170_v1, -inf  ;;  %v4532_v21 = vadd.f32 %v2945_v18, %v3947_v58 }
 0x284   : > { %2959 = vmatmul.mubr.msk.f32.gmra.mxu1 %vm2121_vm11, %v2106_v32  ;;  %v2378_v46 = vpop.f32.mrf.mxu1 }
 0x285   : > { %v1557_v30 = vpop.permute.xlu1 %1556  ;;  %v2527_v4 = vmax.f32 %v2524_v24, %v2529_v36  ;;  %v2552_v6 = vsel %vm1878_vm4, %v4532_v21, -inf }
 0x286   : > { %v1555_v60 = vpop.permute.xlu0 %1554  ;;  %v2042_v7 = vsel %vm2010_vm8, %v2009_v25, %v1557_v30  ;;  %v2948_v63 = vpop.f32.mrf.mxu1 }
 0x287   : > { %v2933_v37 = vpop.f32.mrf.mxu0  ;;  %v2041_v40 = vsel %vm2010_vm8, %v2008_v53, %v1555_v60  ;;  %v2533_v52 = vmax.f32 %v2522_v50, %v2527_v4 }
 0x288   : > { %v4477_v39 = vadd.f32 %v2933_v37, %v3947_v58  ;;  %v4544_v37 = vld [vmem:[%s4668_s2] ss:$0 sm:$0xff]  ;;  %v2388_v25 = vpop.f32.mrf.mxu1 }
 0x289   : > { %v1685_v17 = vpop.permute.xlu1 %1684  ;;  %v2338_v42 = vpop.f32.mrf.mxu0  ;;  %v2531_v22 = vmax.f32 %v2528_v47, %v2533_v52 }
 0x28a   : > { %v1683_v34 = vpop.permute.xlu0 %1682  ;;  %v4480_v35 = vadd.f32 %v3947_v58, %v2338_v42  ;;  %v2075_v45 = vsel %vm2043_vm9, %v2042_v7, %v1685_v17  ;;  %v2468_v31 = vsel %vm1878_vm4, %v4477_v39, 0.0  ;;  %v2394_v42 = vadd.f32 %v4544_v37, %v2948_v63 }
 0x28b   : > { %v2074_v19 = vsel %vm2043_vm9, %v2041_v40, %v1683_v34  ;;  %v2537_v38 = vmax.f32 %v2526_v54, %v2531_v22  ;;  %v2530_v40 = vsel %vm1878_vm4, %v4404_v29, -inf  ;;  %v2536_v5 = vsel %vm1878_vm4, %v4477_v39, -inf }
 0x28c   : > { %v2466_v62 = vsel %vm1878_vm4, %v4480_v35, 0.0  ;;  %v2556_v7 = vsel %vm1878_vm4, %v2394_v42, -inf  ;;  %v2534_v29 = vsel %vm1878_vm4, %v4480_v35, -inf }
 0x28d   : > { %v1813_v56 = vpop.permute.xlu1 %1812  ;;  %v2467_v33 = vadd.f32 %v2466_v62, %v4414_v12  ;;  %v2535_v34 = vmax.f32 %v2552_v6, %v2537_v38  ;;  %v2484_v6 = vsel %vm1878_vm4, %v4532_v21, 0.0 }
 0x28e   : > { %v1811_v51 = vpop.permute.xlu0 %1810  ;;  %v2108_v44 = vsel %vm2076_vm10, %v2075_v45, %v1813_v56 }
 0x28f   : > { %v2107_v10 = vsel %vm2076_vm10, %v2074_v19, %v1811_v51  ;;  %v2469_v23 = vadd.f32 %v2468_v31, %v2467_v33  ;;  %v2389_v19 = vadd.f32 %v4544_v37, %v2388_v25 }
 0x290   : > { %2961 = vmatprep.mubr.msk.f32.mxu1 %vm2121_vm11, %v2107_v10 }
 0x291   : > { %2962 = vmatmul.mubr.msk.f32.gmra.mxu1 %vm2121_vm11, %v2108_v44  ;;  %v2554_v51 = vsel %vm1878_vm4, %v2389_v19, -inf }
 0x292   : > { %2968 = vmatprep.mubr.msk.f32.mxu1 %vm3115_vm12, %v3106_v0 }
 0x2a7   : > { %v2951_v56 = vpop.f32.mrf.mxu1 }
 0x2a8   : > { %v2404_v10 = vadd.f32 %v4544_v37, %v2951_v56 }
 0x2a9   : > { %v2398_v31 = vpop.f32.mrf.mxu1 }
 0x2c7   : > { %v2936_v61 = vpop.f32.mrf.mxu0 }
 0x2c8   : > { %v4496_v26 = vadd.f32 %v2936_v61, %v3947_v58  ;;  %v2399_v61 = vadd.f32 %v4544_v37, %v2398_v31 }
 0x2c9   : > { %v2348_v49 = vpop.f32.mrf.mxu0 }
 0x2ca   : > { %v4499_v14 = vadd.f32 %v3947_v58, %v2348_v49  ;;  %v2472_v43 = vsel %vm1878_vm4, %v4496_v26, 0.0  ;;  %v2540_v39 = vsel %vm1878_vm4, %v4496_v26, -inf }
 0x2cc   : > { %v2470_v12 = vsel %vm1878_vm4, %v4499_v14, 0.0  ;;  %v2538_v35 = vsel %vm1878_vm4, %v4499_v14, -inf }
 0x2cd   : > { %v2471_v11 = vadd.f32 %v2470_v12, %v2469_v23  ;;  %v2560_v23 = vsel %vm1878_vm4, %v2404_v10, -inf }
 0x2cf   : > { %v2473_v3 = vadd.f32 %v2472_v43, %v2471_v11  ;;  %v2558_v11 = vsel %vm1878_vm4, %v2399_v61, -inf }
 0x2e7   : > { %v2954_v43 = vpop.f32.mrf.mxu1 }
 0x2e8   : > { %v2414_v55 = vadd.f32 %v4544_v37, %v2954_v43 }
 0x2e9   : > { %v2408_v28 = vpop.f32.mrf.mxu1 }
 0x2ea   : > { %v2564_v20 = vsel %vm1878_vm4, %v2414_v55, -inf  ;;  %v2409_v59 = vadd.f32 %v4544_v37, %v2408_v28 }
 0x2ec   : > { %v2562_v4 = vsel %vm1878_vm4, %v2409_v59, -inf }
 0x308   : > { %v2939_v15 = vpop.f32.mrf.mxu0 }
 0x309   : > { %v2364_v60 = vadd.f32 %v2939_v15, %v3947_v58 }
 0x30a   : > { %v2358_v32 = vpop.f32.mrf.mxu0 }
 0x30b   : > { %v4529_v30 = vadd.f32 %v3947_v58, %v2358_v32  ;;  %v2476_v27 = vsel %vm1878_vm4, %v2364_v60, 0.0  ;;  %v2379_v58 = vadd.f32 %v4544_v37, %v2378_v46  ;;  %v2544_v18 = vsel %vm1878_vm4, %v2364_v60, -inf }
 0x30d   : > { %v2474_v1 = vsel %vm1878_vm4, %v4529_v30, 0.0  ;;  %v2550_v17 = vsel %vm1878_vm4, %v2379_v58, -inf  ;;  %v2482_v46 = vsel %vm1878_vm4, %v2379_v58, 0.0  ;;  %v2488_v58 = vsel %vm1878_vm4, %v2394_v42, 0.0 }
 0x30e   : > { %v2475_v13 = vadd.f32 %v2474_v1, %v2473_v3  ;;  %v2541_v57 = vmax.f32 %v2550_v17, %v2535_v34  ;;  %v2486_v34 = vsel %vm1878_vm4, %v2389_v19, 0.0 }
 0x310   : > { %v2477_v41 = vadd.f32 %v2476_v27, %v2475_v13  ;;  %v2539_v53 = vmax.f32 %v2532_v16, %v2541_v57  ;;  %v2542_v13 = vsel %vm1878_vm4, %v4529_v30, -inf  ;;  %v2490_v30 = vsel %vm1878_vm4, %v2399_v61, 0.0 }
 0x312   : > { %v2545_v45 = vmax.f32 %v2530_v40, %v2539_v53 }
 0x314   : > { %v2553_v62 = vmax.f32 %v2545_v45, %v2556_v7  ;;  %v2492_v7 = vsel %vm1878_vm4, %v2404_v10, 0.0 }
 0x316   : > { %v2543_v33 = vmax.f32 %v2554_v51, %v2553_v62  ;;  %v2494_v51 = vsel %vm1878_vm4, %v2409_v59, 0.0 }
 0x318   : > { %v2551_v44 = vmax.f32 %v2543_v33, %v2536_v5 }
 0x31a   : > { %v2561_v49 = vmax.f32 %v2534_v29, %v2551_v44  ;;  %v2496_v44 = vsel %vm1878_vm4, %v2414_v55, 0.0 }
 0x31c   : > { %v2569_v12 = vmax.f32 %v2561_v49, %v2560_v23 }
 0x31e   : > { %v2559_v3 = vmax.f32 %v2569_v12, %v2558_v11 }
 0x320   : > { %v2567_v9 = vmax.f32 %v2559_v3, %v2540_v39  ;;  %v2957_v50 = vpop.f32.mrf.mxu1 }
 0x321   : > { %v2424_v52 = vadd.f32 %v4544_v37, %v2957_v50 }
 0x322   : > { %v2549_v2 = vmax.f32 %v2538_v35, %v2567_v9  ;;  %v2418_v54 = vpop.f32.mrf.mxu1 }
 0x323   : > { %v2568_v60 = vsel %vm1878_vm4, %v2424_v52, -inf  ;;  %v2500_v12 = vsel %vm1878_vm4, %v2424_v52, 0.0 }
 0x324   : > { %v2557_v24 = vmax.f32 %v2549_v2, %v2564_v20 }
 0x326   : > { %v2547_v47 = vmax.f32 %v2562_v4, %v2557_v24 }
 0x328   : > { %v2555_v1 = vmax.f32 %v2547_v47, %v2544_v18 }
 0x32a   : > { %v2565_v17 = vmax.f32 %v2542_v13, %v2555_v1 }
 0x32c   : > { %v2573_v16 = vmax.f32 %v2565_v17, %v2568_v60  ;;  %v2594_v17 = vld [vmem:[%s4670_s4] sm:$0x1] }
 0x333   : > { %v2942_v8 = vpop.f32.mrf.mxu0 }
 0x334   : > { %v2374_v36 = vadd.f32 %v4544_v37, %v2942_v8 }
 0x335   : > { %v2368_v48 = vpop.f32.mrf.mxu0 }
 0x336   : > { %v2369_v26 = vadd.f32 %v4544_v37, %v2368_v48  ;;  %v2480_v32 = vsel %vm1878_vm4, %v2374_v36, 0.0  ;;  %v2548_v21 = vsel %vm1878_vm4, %v2374_v36, -inf }
 0x338   : > { %v2478_v15 = vsel %vm1878_vm4, %v2369_v26, 0.0  ;;  %v2546_v5 = vsel %vm1878_vm4, %v2369_v26, -inf }
 0x339   : > { %v2479_v14 = vadd.f32 %v2478_v15, %v2477_v41  ;;  %v2419_v41 = vadd.f32 %v4544_v37, %v2418_v54 }
 0x33b   : > { %v2481_v22 = vadd.f32 %v2480_v32, %v2479_v14  ;;  %v2566_v57 = vsel %vm1878_vm4, %v2419_v41, -inf  ;;  %v2498_v10 = vsel %vm1878_vm4, %v2419_v41, 0.0 }
 0x33c   : > { %v2563_v45 = vmax.f32 %v2566_v57, %v2573_v16 }
 0x33d   : > { %v2483_v27 = vadd.f32 %v2482_v46, %v2481_v22 }
 0x33e   : > { %v2571_v56 = vmax.f32 %v2563_v45, %v2548_v21 }
 0x33f   : > { %v2485_v38 = vadd.f32 %v2484_v6, %v2483_v27 }
 0x340   : > { %v2578_v61 = vmax.f32 %v2571_v56, %v2546_v5 }
 0x341   : > { %v2487_v63 = vadd.f32 %v2486_v34, %v2485_v38  ;;  %v2669_v34 = vld [vmem:[%s4671_s5] sm:$0xf] }
 0x343   : > { %v2489_v53 = vadd.f32 %v2488_v58, %v2487_v63 }
 0x344   : > { %v2960_v25 = vpop.f32.mrf.mxu1 }
 0x345   : > { %v2491_v40 = vadd.f32 %v2490_v30, %v2489_v53  ;;  %v2434_v62 = vadd.f32 %v4544_v37, %v2960_v25 }
 0x346   : > { %v2428_v42 = vpop.f32.mrf.mxu1 }
 0x347   : > { %v2493_v19 = vadd.f32 %v2492_v7, %v2491_v40  ;;  %v2572_v31 = vsel %vm1878_vm4, %v2434_v62, -inf  ;;  %v2429_v29 = vadd.f32 %v4544_v37, %v2428_v42  ;;  %v2504_v35 = vsel %vm1878_vm4, %v2434_v62, 0.0 }
 0x348   : > { %v2577_v11 = vmax.f32 %v2572_v31, %v2578_v61 }
 0x349   : > { %v2495_v33 = vadd.f32 %v2494_v51, %v2493_v19  ;;  %v2570_v39 = vsel %vm1878_vm4, %v2429_v29, -inf  ;;  %v2502_v3 = vsel %vm1878_vm4, %v2429_v29, 0.0 }
 0x34a   : > { %v2575_v20 = vmax.f32 %v2570_v39, %v2577_v11 }
 0x34b   : > { %v2497_v23 = vadd.f32 %v2496_v44, %v2495_v33 }
 0x34d   : > { %v2499_v49 = vadd.f32 %v2498_v10, %v2497_v23 }
 0x34f   : > { %v2501_v43 = vadd.f32 %v2500_v12, %v2499_v49 }
 0x351   : > { %v2963_v9 = vpop.f32.mrf.mxu1  ;;  %v2503_v28 = vadd.f32 %v2502_v3, %v2501_v43 }
 0x352   : > { %v2444_v55 = vadd.f32 %v4544_v37, %v2963_v9 }
 0x353   : > { %v2438_v59 = vpop.f32.mrf.mxu1  ;;  %v2505_v48 = vadd.f32 %v2504_v35, %v2503_v28 }
 0x354   : > { %v2576_v8 = vsel %vm1878_vm4, %v2444_v55, -inf  ;;  %v2439_v2 = vadd.f32 %v4544_v37, %v2438_v59  ;;  %v2508_v15 = vsel %vm1878_vm4, %v2444_v55, 0.0 }
 0x355   : > { %v2579_v24 = vmax.f32 %v2575_v20, %v2576_v8 }
 0x356   : > { %v2506_v36 = vsel %vm1878_vm4, %v2439_v2, 0.0  ;;  %v2574_v26 = vsel %vm1878_vm4, %v2439_v2, -inf }
 0x357   : > { %v2507_v4 = vadd.f32 %v2506_v36, %v2505_v48  ;;  %v2580_v50 = vmax.f32 %v2574_v26, %v2579_v24 }
 0x359   : > { %v2509_v18 = vadd.f32 %v2508_v15, %v2507_v4  ;;  %v2581_v14 = vrot.slane %v2580_v50, 4 }
 0x35b   : > { %v2582_v47 = vmax.f32 %v2580_v50, %v2581_v14  ;;  %v2510_v46 = vrot.slane %v2509_v18, 4 }
 0x35d   : > { %v2583_v32 = vrot.slane %v2582_v47, 2  ;;  %v2511_v1 = vadd.f32 %v2510_v46, %v2509_v18 }
 0x35f   : > { %v2584_v52 = vmax.f32 %v2582_v47, %v2583_v32  ;;  %v2512_v54 = vrot.slane %v2511_v1, 2 }
 0x361   : > { %v2585_v37 = vrot.slane %v2584_v52, 1  ;;  %v2513_v13 = vadd.f32 %v2512_v54, %v2511_v1 }
 0x363   : > { %v2586_v22 = vmax.f32 %v2584_v52, %v2585_v37  ;;  %v2514_v27 = vrot.slane %v2513_v13, 1 }
 0x365   : > { %2588 = vrot.lane.b32.xlu0 %v2586_v22, %s3107_s18  ;;  %v2515_v6 = vadd.f32 %v2514_v27, %v2513_v13  ;;  %s3050_s18 = scalar_lea.vmem %s3049_s8, 32 }
 0x366   : > { %p3052_p1 = scmp.lt.s32.totalorder %s3050_s18, %s3044_s29 }
 0x367   : > { %v2517_v60 = vmul.f32 0.00390625, %v2515_v6 }
 0x368   : > { %p3053_p2 = por %p3052_p1, %p3051_p0 }
 0x36a   : > { %p3054_p3 = pnand %p3053_p2, %p3047_p13 }
 0x3d7   : > { %v2589_v41 = vpop.permute.xlu0 %2588 }
 0x3d8   : > { %v2591_v38 = vsel %vm1878_vm4, %v2517_v60, %v2589_v41 }
 0x3d9   : > { %2969 = vmatmul.mubr.msk.f32.vlgmr.msra.gmra.mxu1 %vm1944_vm6, %v2591_v38 }
 0x3da   : > { %2973 = vmatprep.mubr.msk.f32.mxu1 %vm3115_vm12, %v3106_v0  ;;  %2972 = vmatpush3.msk.msra.mxu1 %vm2218_vm3, %v2669_v34  ;;  %v2670_v0 = vld [vmem:[%s4672_s6] sm:$0x1] }
 0x499   : > { %v2664_v63 = vpop.f32.mrf.mxu1 }
 0x49a   : > { %v2665_v58 = vadd.f32 %v2664_v63, %v2594_v17 }
 0x49b   : > { %v2970_v16 = vpop.f32.mrf.mxu1 }
 0x49c   : > { %v2668_v57 = vmax.f32 %v2665_v58, 0.0 }
 0x49e   : > { %2974 = vmatmul.mubr.msk.f32.vlgmr.msra.gmra.mxu1 %vm476_vm1, %v2668_v57 }
 0x55e   : > { %v2743_v53 = vpop.f32.mrf.mxu1 }
 0x55f   : > { %v2744_v30 = vadd.f32 %v2743_v53, %v2670_v0 }
 0x560   : > { %v2975_v25 = vpop.f32.mrf.mxu1 }
 0x561   : > { %2748 = vst.msk [vmem:[%s270_s19] sm:$0x1] %vm2747_vm13, %v2744_v30 }
 0x562   : > { %3057 = shalt.err (!%p3054_p3)
}
 0x563   : > { %s3058_s9 = scalar_lea.hbm %s4631_s23, 16  ;;  %s3062_s17 = scalar_lea.hbm %s4673_s7, 32 }
 0x564   : > { %p3059_p4 = scmp.ne.s32.totalorder %s4631_s23, %s3058_s9  ;;  %p3063_p9 = scmp.lt.s32.totalorder %s4631_s23, %s4673_s7 }
 0x565   : > { %p3064_p10 = scmp.lt.s32.totalorder %s3062_s17, %s3058_s9 }
 0x566   : > { %p3060_p7 = pnand %p3059_p4, %p3195_p5 }
 0x567   : > { %p3065_p11 = por %p3064_p10, %p3063_p9 }
 0x568   : > { %p3061_p8 = pneg %p3060_p7 }
 0x56a   : > { %p3066_p12 = pnand %p3065_p11, %p3061_p8 }
 0x56c   : > { %3069 = shalt.err (!%p3066_p12)
}
 0x56d   : > { %2986 = dma.vmem_to_hbm [thread:$0]  (%p3195_p5), %s2763_s20, 16, %s4631_s23, %s2750_s16  }
 0x56e PF: > { %p2992_p13 = scmp.ge.s32.totalorder %s3104_s27, 2  ;;  %s2774_s21 = sand.u32 1, %s3092_s24  }
 0x56f   : > { %s2775_s22 = scalar_lea.sflag [#allocation4], %s2774_s21 }
 0x570   : > { %p2989_p0 = pnand %p2992_p13, %p3199_p6 }
 0x572   : > { %p2990_p1 = pneg %p2989_p0 }
 0x574   : > { %3087 = dma.done.wait (%p2990_p1), %s2775_s22, 16  }
 0x575   : > { %3089 = vsyncadd (%p2990_p1), %s2775_s22, 4294967280  ;;  %p17_p2 = scmp.ge.s32.totalorder %s3182_s30, 4   ;;  %s4676_s24 = smov %s3096_s25 }
 0x576   : > { %s4677_s25 = smov %s3100_s26  ;;  %s4678_s26 = smov %s3193_s10 }
 0x577   : > { %s4679_s27 = smov %s3182_s30  ;;  %19 = sbr.rel (!%p17_p2) target bundleno = 3 (0x3), region = 85 }
 0x57c   :  { %2779 = vsyncpa [#allocation4], 1 }
 0x57d   :  { %2781 = vsyncpa [#allocation4 + $0x1], 1 }

</bundles_post_ra>
